<compile_context>
chip_gen: v5e
topology: v5e:2x2
jax: 0.10.0
libtpu: 0.0.40
codegen_flags: <defaults>
</compile_context>

<pallas_src>
import jax
import jax.numpy as jnp
from jax import lax
from jax.experimental import pallas as pl
from jax.experimental.pallas import tpu as pltpu

_SQRT_2_OVER_PI = 0.7978845608028654


def _gelu(x):
    # TODO(synk): nn.GELU() defaults to the exact erf form; we use the tanh
    # approximation (<~1e-3 difference) for a guaranteed TPU-Pallas lowering.
    return 0.5 * x * (1.0 + jnp.tanh(_SQRT_2_OVER_PI * (x + 0.044715 * (x * x * x))))


def _bn_scale_shift(gamma, beta, mean, var, eps=1e-5):
    s = gamma * jax.lax.rsqrt(var + eps)
    return s, beta - mean * s


def _fold_params(p):
    """Fold the eval-mode BatchNorms into the adjacent conv weights / biases."""
    s0, t0 = _bn_scale_shift(p["bn0_g"], p["bn0_b"], p["bn0_m"], p["bn0_v"])  # PreNorm
    s1, t1 = _bn_scale_shift(p["bn1_g"], p["bn1_b"], p["bn1_m"], p["bn1_v"])
    s2, t2 = _bn_scale_shift(p["bn2_g"], p["bn2_b"], p["bn2_m"], p["bn2_v"])
    s3, t3 = _bn_scale_shift(p["bn3_g"], p["bn3_b"], p["bn3_m"], p["bn3_v"])

    w1 = p["w1"][:, :, 0, 0]                                    # (Chid, Cin)
    w1f = (w1 * s0[None, :] * s1[:, None]).T                    # (Cin, Chid)
    b1f = s1 * (w1 @ t0) + t1                                   # (Chid,)

    dwf = jnp.transpose(p["w_dw"][:, 0, :, :], (1, 2, 0)) * s2  # (3, 3, Chid)
    b2f = t2                                                    # (Chid,)

    w2 = p["w2"][:, :, 0, 0]                                    # (Cout, Chid)
    w2f = (w2 * s3[:, None]).T                                  # (Chid, Cout)
    b3f = t3                                                    # (Cout,)
    return dict(w1f=w1f, b1f=b1f, dwf=dwf, b2f=b2f, w2f=w2f, b3f=b3f)


def _mbconv_stage1_kernel(x_ref, w1_ref, b1_ref, dw_ref, b2_ref, y6_ref, sums_ref):
    """Fused PreNorm-BN + 1x1 conv + BN + GELU + depthwise3x3 + BN + GELU.

    x_ref   : (1, H+2, Wp, Cin)  spatially zero-padded input, bf16 (Wp >= W+2, mult. of 8)
    w1_ref  : (Cin, Chid)        folded pointwise weight, bf16
    b1_ref  : (1, Chid)          folded pointwise bias, f32
    dw_ref  : (9, Chid)          folded depthwise taps, tap-major, f32
    b2_ref  : (1, Chid)          folded depthwise bias, f32
    y6_ref  : (1, TH, W, Chid)   bf16 activation tile (lane-dense, Chid lanes)
    sums_ref: (1, 8, Chid)       per-channel spatial sums for SE (all 8 rows identical), f32
    """
    r = pl.program_id(1)
    TH, W, Chid = y6_ref.shape[1], y6_ref.shape[2], y6_ref.shape[3]
    H = x_ref.shape[1] - 2
    Wp = x_ref.shape[2]
    Cin = x_ref.shape[3]

    row0 = pl.multiple_of(r * TH, TH)
    xwin = x_ref[0, pl.ds(row0, TH + 2), :, :]                  # (TH+2, Wp, Cin) bf16

    # Pointwise stage: one MXU matmul over the whole halo window (the 2 halo rows
    # are recomputed per tile; cheap pointwise work).
    y2 = jnp.dot(xwin.reshape((TH + 2) * Wp, Cin), w1_ref[...],
                 preferred_element_type=jnp.float32) + b1_ref[...]
    y3 = _gelu(y2).reshape(TH + 2, Wp, Chid)

    # The depthwise conv zero-pads its *input* (y3); positions mapping to spatial
    # padding must therefore be zeroed here (they hold gelu(b1), not 0).
    row_img = r * TH - 1 + lax.broadcasted_iota(jnp.int32, (TH + 2, Wp, 1), 0)
    col_img = lax.broadcasted_iota(jnp.int32, (TH + 2, Wp, 1), 1) - 1
    valid = (row_img >= 0) & (row_img < H) & (col_img >= 0) & (col_img < W)
    y3 = jnp.where(valid, y3, 0.0)

    # Depthwise 3x3 (BN scale folded into the taps): 9 shifted VPU multiply-adds.
    acc = jnp.zeros((TH, W, Chid), jnp.float32)
    for ky in range(3):
        for kx in range(3):
            k = ky * 3 + kx
            tap = dw_ref[k:k + 1, :]                            # (1, Chid) f32
            acc = acc + y3[ky:ky + TH, kx:kx + W, :] * tap
    y6 = _gelu(acc + b2_ref[...])                               # (TH, W, Chid) f32

    y6_ref[0, :, :, :] = y6.astype(y6_ref.dtype)

    # Per-channel spatial sums for SE's global average pool: resident accumulator
    # across the row-tile axis (that grid axis is marked "arbitrary").
    @pl.when(r == 0)
    def _():
        sums_ref[...] = jnp.zeros_like(sums_ref)
    sums_ref[...] += jnp.sum(y6, axis=(0, 1), keepdims=True)


def _mbconv_stage2_kernel(y6_ref, w2_ref, b3_ref, out_ref):
    """SE channel gating + final 1x1 conv + BN: one MXU matmul per tile.

    y6_ref : (1, TH, W, Chid)  bf16 activation tile from stage 1
    w2_ref : (1, Chid, Cout)   per-batch bf16 weight with the SE gate & BN folded in
    b3_ref : (1, Cout)         folded bias, f32
    out_ref: (1, TH, W, Cout)  f32 output tile
    """
    TH, W, Chid = y6_ref.shape[1], y6_ref.shape[2], y6_ref.shape[3]
    Cout = out_ref.shape[3]
    y = jnp.dot(y6_ref[0, :, :, :].reshape(TH * W, Chid), w2_ref[0, :, :],
                preferred_element_type=jnp.float32) + b3_ref[...]
    out_ref[0, :, :, :] = y.reshape(TH, W, Cout)


def mbconv_forward_nhwc(x, params, *, block_rows=8):
    """MBConv forward (expansion > 1, downsample=False, BN in eval mode), NHWC.

    x: (N, H, W, Cin) float32.  Returns (N, H, W, Cout) float32.
    """
    N, H, W, Cin = x.shape
    fp = _fold_params(params)
    Chid = fp["w1f"].shape[1]
    Cout = fp["w2f"].shape[1]

    # TODO(synk): get_valid_padding(3, dilation) in the reference uses an undefined
    # `dilation` and returns the float 2.0 which nn.Conv2d rejects; we use the
    # standard "same" padding of 1 for the 3x3 depthwise conv instead.
    # TODO(synk): masked short last tile (pl.cdiv) for H not divisible by block_rows.
    TH = block_rows if H % block_rows == 0 else H
    R = H // TH
    cdt = jnp.bfloat16

    # Zero-pad H by 1 on each side; pad W to a multiple of 8 (1 on the left, rest on
    # the right) so the in-kernel (rows, Wp, C) -> (rows*Wp, C) reshape is tile-aligned.
    Wp = ((W + 2 + 7) // 8) * 8
    xpad = jnp.pad(x.astype(cdt), ((0, 0), (1, 1), (1, Wp - W - 1), (0, 0)))

    w1 = fp["w1f"].astype(cdt)
    b1 = fp["b1f"].reshape(1, Chid).astype(jnp.float32)
    dw = fp["dwf"].reshape(9, Chid).astype(jnp.float32)
    b2 = fp["b2f"].reshape(1, Chid).astype(jnp.float32)

    # TODO(synk): for very large images the whole-image x block (constant in r)
    # should become halo'd row tiles so VMEM scales with the tile, not the image.
    y6, sums = pl.pallas_call(
        _mbconv_stage1_kernel,
        out_shape=(jax.ShapeDtypeStruct((N, H, W, Chid), cdt),
                   jax.ShapeDtypeStruct((N, 8, Chid), jnp.float32)),
        grid_spec=pltpu.PrefetchScalarGridSpec(
            num_scalar_prefetch=0,
            grid=(N, R),
            in_specs=[
                pl.BlockSpec((1, H + 2, Wp, Cin), lambda n, r: (n, 0, 0, 0)),
                pl.BlockSpec((Cin, Chid), lambda n, r: (0, 0)),
                pl.BlockSpec((1, Chid), lambda n, r: (0, 0)),
                pl.BlockSpec((9, Chid), lambda n, r: (0, 0)),
                pl.BlockSpec((1, Chid), lambda n, r: (0, 0)),
            ],
            out_specs=[
                pl.BlockSpec((1, TH, W, Chid), lambda n, r: (n, r, 0, 0)),
                pl.BlockSpec((1, 8, Chid), lambda n, r: (n, 0, 0)),
            ],
        ),
        compiler_params=pltpu.CompilerParams(
            dimension_semantics=("parallel", "arbitrary"),
            vmem_limit_bytes=48 * 1024 * 1024),  # fits v7x's 64 MiB physical VMEM
    )(xpad, w1, b1, dw, b2)

    # TODO(synk): SE's tiny per-batch MLP (+ sigmoid) and the gate/BN fold into the
    # last 1x1 weight run as plain XLA glue between the two pallas_calls.
    mean = sums[:, 0, :] / float(H * W)                            # (N, Chid) f32
    hse = _gelu(mean @ params["w_se1"].T)                          # (N, Cse)
    gate = jax.nn.sigmoid(hse @ params["w_se2"].T)                 # (N, Chid)
    w2g = (fp["w2f"][None, :, :] * gate[:, :, None]).astype(cdt)   # (N, Chid, Cout)
    b3 = fp["b3f"].reshape(1, Cout).astype(jnp.float32)

    out = pl.pallas_call(
        _mbconv_stage2_kernel,
        out_shape=jax.ShapeDtypeStruct((N, H, W, Cout), jnp.float32),
        grid_spec=pltpu.PrefetchScalarGridSpec(
            num_scalar_prefetch=0,
            grid=(N, R),
            in_specs=[
                pl.BlockSpec((1, TH, W, Chid), lambda n, r: (n, r, 0, 0)),
                pl.BlockSpec((1, Chid, Cout), lambda n, r: (n, 0, 0)),
                pl.BlockSpec((1, Cout), lambda n, r: (0, 0)),
            ],
            out_specs=pl.BlockSpec((1, TH, W, Cout), lambda n, r: (n, r, 0, 0)),
        ),
        compiler_params=pltpu.CompilerParams(
            dimension_semantics=("parallel", "parallel"),
            vmem_limit_bytes=48 * 1024 * 1024),
    )(y6, w2g, b3)
    return out


def mbconv_forward(x_nchw, params, *, block_rows=8):
    """NCHW convenience wrapper matching the PyTorch module's interface.

    Implements MBConv with expansion > 1 and downsample=False.
    TODO(synk): downsample=True branch (MaxPool2d(3,2,1) + 1x1 proj + residual) and
    the expansion == 1 (pure depthwise) variant are not implemented here.
    """
    x = jnp.transpose(x_nchw, (0, 2, 3, 1))
    out = mbconv_forward_nhwc(x, params, block_rows=block_rows)
    return jnp.transpose(out, (0, 3, 1, 2))


def _reference_forward_nhwc(x, params):
    """Structurally independent JAX reference (bf16 matmul operands, f32 math)."""
    fp = _fold_params(params)
    cdt = jnp.bfloat16
    N, H, W, _ = x.shape
    Chid = fp["w1f"].shape[1]

    y2 = jnp.einsum("nhwi,io->nhwo", x.astype(cdt), fp["w1f"].astype(cdt),
                    preferred_element_type=jnp.float32) + fp["b1f"]
    y3 = _gelu(y2)
    y3p = jnp.pad(y3, ((0, 0), (1, 1), (1, 1), (0, 0)))
    y4 = jnp.zeros((N, H, W, Chid), jnp.float32)
    for ky in range(3):
        for kx in range(3):
            y4 = y4 + y3p[:, ky:ky + H, kx:kx + W, :] * fp["dwf"][ky, kx, :]
    y6 = _gelu(y4 + fp["b2f"])

    mean = jnp.mean(y6, axis=(1, 2))                               # (N, Chid)
    hse = _gelu(mean @ params["w_se1"].T)
    gate = jax.nn.sigmoid(hse @ params["w_se2"].T)                 # (N, Chid)
    y7 = y6 * gate[:, None, None, :]

    out = jnp.einsum("nhwc,co->nhwo", y7.astype(cdt), fp["w2f"].astype(cdt),
                     preferred_element_type=jnp.float32) + fp["b3f"]
    return out


def _reference_forward(x_nchw, params):
    x = jnp.transpose(x_nchw, (0, 2, 3, 1))
    out = _reference_forward_nhwc(x, params)
    return jnp.transpose(out, (0, 3, 1, 2))


if __name__ == "__main__":
    # MBConv(inp=32, oup=64, expansion=4), downsample=False (stride 1).
    inp, oup, expansion = 32, 64, 4
    N, H, W = 2, 16, 16
    hidden = int(inp * expansion)          # 128
    se_dim = int(inp * 0.25)               # 8

    key = jax.random.PRNGKey(0)
    ks = list(jax.random.split(key, 22))

    def bn_params(i, c):
        return (1.0 + 0.1 * jax.random.normal(ks[i], (c,)),        # gamma
                0.1 * jax.random.normal(ks[i + 1], (c,)),           # beta
                0.1 * jax.random.normal(ks[i + 2], (c,)),           # running mean
                0.5 + jax.random.uniform(ks[i + 3], (c,)))          # running var

    g0, be0, m0, v0 = bn_params(0, inp)        # PreNorm BatchNorm2d(inp)
    g1, be1, m1, v1 = bn_params(4, hidden)
    g2, be2, m2, v2 = bn_params(8, hidden)
    g3, be3, m3, v3 = bn_params(12, oup)

    params = dict(
        bn0_g=g0, bn0_b=be0, bn0_m=m0, bn0_v=v0,
        w1=0.1 * jax.random.normal(ks[16], (hidden, inp, 1, 1)),    # Conv2d(inp, hidden, 1)
        bn1_g=g1, bn1_b=be1, bn1_m=m1, bn1_v=v1,
        w_dw=0.2 * jax.random.normal(ks[17], (hidden, 1, 3, 3)),    # depthwise Conv2d 3x3
        bn2_g=g2, bn2_b=be2, bn2_m=m2, bn2_v=v2,
        w_se1=0.3 * jax.random.normal(ks[18], (se_dim, hidden)),    # SE Linear(hidden -> se)
        w_se2=0.3 * jax.random.normal(ks[19], (hidden, se_dim)),    # SE Linear(se -> hidden)
        w2=0.1 * jax.random.normal(ks[20], (oup, hidden, 1, 1)),    # Conv2d(hidden, oup, 1)
        bn3_g=g3, bn3_b=be3, bn3_m=m3, bn3_v=v3,
    )
    x = jax.random.normal(ks[21], (N, inp, H, W), jnp.float32)

    out = jax.block_until_ready(jax.jit(mbconv_forward)(x, params))
    ref = _reference_forward(x, params)

    assert out.shape == (N, oup, H, W), out.shape
    err = float(jnp.max(jnp.abs(out - ref)))
    assert err < 2e-2, err
    print("KERNEL_OK")
</pallas_src>

<mosaic_0001>
module attributes {stable_mosaic.version = 11 : i64} {
  func.func @_mbconv_stage1_kernel(%arg0: i32, %arg1: i32, %arg2: memref<1x18x24x32xbf16, #tpu.memory_space<vmem>>, %arg3: memref<32x128xbf16, #tpu.memory_space<vmem>>, %arg4: memref<1x128xf32, #tpu.memory_space<vmem>>, %arg5: memref<9x128xf32, #tpu.memory_space<vmem>>, %arg6: memref<1x128xf32, #tpu.memory_space<vmem>>, %arg7: memref<1x8x16x128xbf16, #tpu.memory_space<vmem>>, %arg8: memref<1x8x128xf32, #tpu.memory_space<vmem>>) attributes {dimension_semantics = [#tpu.dimension_semantics<parallel>, #tpu.dimension_semantics<arbitrary>], iteration_bounds = array<i64: 2, 2>, scalar_prefetch = 0 : i64, scratch_operands = 0 : i64, tpu.core_type = #tpu.core_type<tc>, window_params = [{transform_indices = @transform_0, window_bounds = array<i64: 1, 18, 24, 32>}, {pipeline_mode = #tpu.pipeline_mode<synchronous>, transform_indices = @transform_1, window_bounds = array<i64: 32, 128>}, {pipeline_mode = #tpu.pipeline_mode<synchronous>, transform_indices = @transform_2, window_bounds = array<i64: 1, 128>}, {pipeline_mode = #tpu.pipeline_mode<synchronous>, transform_indices = @transform_3, window_bounds = array<i64: 9, 128>}, {pipeline_mode = #tpu.pipeline_mode<synchronous>, transform_indices = @transform_4, window_bounds = array<i64: 1, 128>}, {transform_indices = @transform_5, window_bounds = array<i64: 1, 8, 16, 128>}, {transform_indices = @transform_6, window_bounds = array<i64: 1, 8, 128>}]} {
    %c8_i32 = arith.constant 8 : i32
    %0 = arith.muli %arg1, %c8_i32 : i32
    %1 = tpu.assume_multiple %0, 8 : i32
    %c0 = arith.constant 0 : index
    %2 = arith.index_cast %1 : i32 to index
    %c0_0 = arith.constant 0 : index
    %c0_1 = arith.constant 0 : index
    %3 = vector.load %arg2[%c0, %2, %c0_0, %c0_1] : memref<1x18x24x32xbf16, #tpu.memory_space<vmem>>, vector<1x10x24x32xbf16>
    %4 = vector.shape_cast %3 : vector<1x10x24x32xbf16> to vector<10x24x32xbf16>
    %5 = vector.shape_cast %4 : vector<10x24x32xbf16> to vector<240x32xbf16>
    %c0_2 = arith.constant 0 : index
    %c0_3 = arith.constant 0 : index
    %6 = vector.load %arg3[%c0_2, %c0_3] : memref<32x128xbf16, #tpu.memory_space<vmem>>, vector<32x128xbf16>
    %cst = arith.constant dense<0.000000e+00> : vector<240x128xf32>
    %7 = tpu.matmul %5, %6, %cst {dimension_numbers = #tpu.dot_dimension_numbers<[1], [0], [0], [1], [0, 0, 1, 1], [], []>} : vector<240x32xbf16>, vector<32x128xbf16>, vector<240x128xf32> -> vector<240x128xf32>
    %c0_4 = arith.constant 0 : index
    %c0_5 = arith.constant 0 : index
    %8 = vector.load %arg4[%c0_4, %c0_5] : memref<1x128xf32, #tpu.memory_space<vmem>>, vector<1x128xf32>
    %9 = vector.broadcast %8 : vector<1x128xf32> to vector<240x128xf32>
    %10 = arith.addf %7, %9 : vector<240x128xf32>
    %cst_6 = arith.constant 5.000000e-01 : f32
    %11 = vector.broadcast %cst_6 : f32 to vector<240x128xf32>
    %12 = arith.mulf %11, %10 : vector<240x128xf32>
    %13 = arith.mulf %10, %10 : vector<240x128xf32>
    %14 = arith.mulf %13, %10 : vector<240x128xf32>
    %cst_7 = arith.constant 4.471500e-02 : f32
    %15 = vector.broadcast %cst_7 : f32 to vector<240x128xf32>
    %16 = arith.mulf %15, %14 : vector<240x128xf32>
    %17 = arith.addf %10, %16 : vector<240x128xf32>
    %cst_8 = arith.constant 0.797884583 : f32
    %18 = vector.broadcast %cst_8 : f32 to vector<240x128xf32>
    %19 = arith.mulf %18, %17 : vector<240x128xf32>
    %20 = math.tanh %19 : vector<240x128xf32>
    %cst_9 = arith.constant 1.000000e+00 : f32
    %21 = vector.broadcast %cst_9 : f32 to vector<240x128xf32>
    %22 = arith.addf %21, %20 : vector<240x128xf32>
    %23 = arith.mulf %12, %22 : vector<240x128xf32>
    %24 = vector.shape_cast %23 : vector<240x128xf32> to vector<10x24x128xf32>
    %c8_i32_10 = arith.constant 8 : i32
    %25 = arith.muli %arg1, %c8_i32_10 : i32
    %c1_i32 = arith.constant 1 : i32
    %26 = arith.subi %25, %c1_i32 : i32
    %27 = tpu.iota {dimensions = array<i32: 0>} : vector<10x24x1xi32>
    %28 = vector.broadcast %26 : i32 to vector<10x24x1xi32>
    %29 = arith.addi %28, %27 : vector<10x24x1xi32>
    %30 = tpu.iota {dimensions = array<i32: 1>} : vector<10x24x1xi32>
    %c1_i32_11 = arith.constant 1 : i32
    %31 = vector.broadcast %c1_i32_11 : i32 to vector<10x24x1xi32>
    %32 = arith.subi %30, %31 : vector<10x24x1xi32>
    %c0_i32 = arith.constant 0 : i32
    %33 = vector.broadcast %c0_i32 : i32 to vector<10x24x1xi32>
    %34 = arith.cmpi sge, %29, %33 : vector<10x24x1xi32>
    %c16_i32 = arith.constant 16 : i32
    %35 = vector.broadcast %c16_i32 : i32 to vector<10x24x1xi32>
    %36 = arith.cmpi slt, %29, %35 : vector<10x24x1xi32>
    %37 = arith.andi %34, %36 : vector<10x24x1xi1>
    %c0_i32_12 = arith.constant 0 : i32
    %38 = vector.broadcast %c0_i32_12 : i32 to vector<10x24x1xi32>
    %39 = arith.cmpi sge, %32, %38 : vector<10x24x1xi32>
    %40 = arith.andi %37, %39 : vector<10x24x1xi1>
    %c16_i32_13 = arith.constant 16 : i32
    %41 = vector.broadcast %c16_i32_13 : i32 to vector<10x24x1xi32>
    %42 = arith.cmpi slt, %32, %41 : vector<10x24x1xi32>
    %43 = arith.andi %40, %42 : vector<10x24x1xi1>
    %cst_14 = arith.constant 0.000000e+00 : f32
    %44 = vector.shape_cast %43 : vector<10x24x1xi1> to vector<10x24x1xi1>
    %45 = vector.broadcast %44 : vector<10x24x1xi1> to vector<10x24x128xi1>
    %46 = vector.broadcast %cst_14 : f32 to vector<10x24x128xf32>
    %47 = arith.select %45, %24, %46 : vector<10x24x128xi1>, vector<10x24x128xf32>
    %cst_15 = arith.constant 0.000000e+00 : f32
    %48 = vector.broadcast %cst_15 : f32 to vector<8x16x128xf32>
    %c0_16 = arith.constant 0 : index
    %c0_17 = arith.constant 0 : index
    %49 = vector.load %arg5[%c0_16, %c0_17] : memref<9x128xf32, #tpu.memory_space<vmem>>, vector<1x128xf32>
    %50 = vector.extract_strided_slice %47 {offsets = [0, 0, 0], sizes = [8, 16, 128], strides = [1, 1, 1]} : vector<10x24x128xf32> to vector<8x16x128xf32>
    %51 = vector.shape_cast %49 : vector<1x128xf32> to vector<1x1x128xf32>
    %52 = vector.broadcast %51 : vector<1x1x128xf32> to vector<8x16x128xf32>
    %53 = arith.mulf %50, %52 : vector<8x16x128xf32>
    %54 = arith.addf %48, %53 : vector<8x16x128xf32>
    %c1 = arith.constant 1 : index
    %c0_18 = arith.constant 0 : index
    %55 = vector.load %arg5[%c1, %c0_18] : memref<9x128xf32, #tpu.memory_space<vmem>>, vector<1x128xf32>
    %56 = vector.extract_strided_slice %47 {offsets = [0, 1, 0], sizes = [8, 16, 128], strides = [1, 1, 1]} : vector<10x24x128xf32> to vector<8x16x128xf32>
    %57 = vector.shape_cast %55 : vector<1x128xf32> to vector<1x1x128xf32>
    %58 = vector.broadcast %57 : vector<1x1x128xf32> to vector<8x16x128xf32>
    %59 = arith.mulf %56, %58 : vector<8x16x128xf32>
    %60 = arith.addf %54, %59 : vector<8x16x128xf32>
    %c2 = arith.constant 2 : index
    %c0_19 = arith.constant 0 : index
    %61 = vector.load %arg5[%c2, %c0_19] : memref<9x128xf32, #tpu.memory_space<vmem>>, vector<1x128xf32>
    %62 = vector.extract_strided_slice %47 {offsets = [0, 2, 0], sizes = [8, 16, 128], strides = [1, 1, 1]} : vector<10x24x128xf32> to vector<8x16x128xf32>
    %63 = vector.shape_cast %61 : vector<1x128xf32> to vector<1x1x128xf32>
    %64 = vector.broadcast %63 : vector<1x1x128xf32> to vector<8x16x128xf32>
    %65 = arith.mulf %62, %64 : vector<8x16x128xf32>
    %66 = arith.addf %60, %65 : vector<8x16x128xf32>
    %c3 = arith.constant 3 : index
    %c0_20 = arith.constant 0 : index
    %67 = vector.load %arg5[%c3, %c0_20] : memref<9x128xf32, #tpu.memory_space<vmem>>, vector<1x128xf32>
    %68 = vector.extract_strided_slice %47 {offsets = [1, 0, 0], sizes = [8, 16, 128], strides = [1, 1, 1]} : vector<10x24x128xf32> to vector<8x16x128xf32>
    %69 = vector.shape_cast %67 : vector<1x128xf32> to vector<1x1x128xf32>
    %70 = vector.broadcast %69 : vector<1x1x128xf32> to vector<8x16x128xf32>
    %71 = arith.mulf %68, %70 : vector<8x16x128xf32>
    %72 = arith.addf %66, %71 : vector<8x16x128xf32>
    %c4 = arith.constant 4 : index
    %c0_21 = arith.constant 0 : index
    %73 = vector.load %arg5[%c4, %c0_21] : memref<9x128xf32, #tpu.memory_space<vmem>>, vector<1x128xf32>
    %74 = vector.extract_strided_slice %47 {offsets = [1, 1, 0], sizes = [8, 16, 128], strides = [1, 1, 1]} : vector<10x24x128xf32> to vector<8x16x128xf32>
    %75 = vector.shape_cast %73 : vector<1x128xf32> to vector<1x1x128xf32>
    %76 = vector.broadcast %75 : vector<1x1x128xf32> to vector<8x16x128xf32>
    %77 = arith.mulf %74, %76 : vector<8x16x128xf32>
    %78 = arith.addf %72, %77 : vector<8x16x128xf32>
    %c5 = arith.constant 5 : index
    %c0_22 = arith.constant 0 : index
    %79 = vector.load %arg5[%c5, %c0_22] : memref<9x128xf32, #tpu.memory_space<vmem>>, vector<1x128xf32>
    %80 = vector.extract_strided_slice %47 {offsets = [1, 2, 0], sizes = [8, 16, 128], strides = [1, 1, 1]} : vector<10x24x128xf32> to vector<8x16x128xf32>
    %81 = vector.shape_cast %79 : vector<1x128xf32> to vector<1x1x128xf32>
    %82 = vector.broadcast %81 : vector<1x1x128xf32> to vector<8x16x128xf32>
    %83 = arith.mulf %80, %82 : vector<8x16x128xf32>
    %84 = arith.addf %78, %83 : vector<8x16x128xf32>
    %c6 = arith.constant 6 : index
    %c0_23 = arith.constant 0 : index
    %85 = vector.load %arg5[%c6, %c0_23] : memref<9x128xf32, #tpu.memory_space<vmem>>, vector<1x128xf32>
    %86 = vector.extract_strided_slice %47 {offsets = [2, 0, 0], sizes = [8, 16, 128], strides = [1, 1, 1]} : vector<10x24x128xf32> to vector<8x16x128xf32>
    %87 = vector.shape_cast %85 : vector<1x128xf32> to vector<1x1x128xf32>
    %88 = vector.broadcast %87 : vector<1x1x128xf32> to vector<8x16x128xf32>
    %89 = arith.mulf %86, %88 : vector<8x16x128xf32>
    %90 = arith.addf %84, %89 : vector<8x16x128xf32>
    %c7 = arith.constant 7 : index
    %c0_24 = arith.constant 0 : index
    %91 = vector.load %arg5[%c7, %c0_24] : memref<9x128xf32, #tpu.memory_space<vmem>>, vector<1x128xf32>
    %92 = vector.extract_strided_slice %47 {offsets = [2, 1, 0], sizes = [8, 16, 128], strides = [1, 1, 1]} : vector<10x24x128xf32> to vector<8x16x128xf32>
    %93 = vector.shape_cast %91 : vector<1x128xf32> to vector<1x1x128xf32>
    %94 = vector.broadcast %93 : vector<1x1x128xf32> to vector<8x16x128xf32>
    %95 = arith.mulf %92, %94 : vector<8x16x128xf32>
    %96 = arith.addf %90, %95 : vector<8x16x128xf32>
    %c8 = arith.constant 8 : index
    %c0_25 = arith.constant 0 : index
    %97 = vector.load %arg5[%c8, %c0_25] : memref<9x128xf32, #tpu.memory_space<vmem>>, vector<1x128xf32>
    %98 = vector.extract_strided_slice %47 {offsets = [2, 2, 0], sizes = [8, 16, 128], strides = [1, 1, 1]} : vector<10x24x128xf32> to vector<8x16x128xf32>
    %99 = vector.shape_cast %97 : vector<1x128xf32> to vector<1x1x128xf32>
    %100 = vector.broadcast %99 : vector<1x1x128xf32> to vector<8x16x128xf32>
    %101 = arith.mulf %98, %100 : vector<8x16x128xf32>
    %102 = arith.addf %96, %101 : vector<8x16x128xf32>
    %c0_26 = arith.constant 0 : index
    %c0_27 = arith.constant 0 : index
    %103 = vector.load %arg6[%c0_26, %c0_27] : memref<1x128xf32, #tpu.memory_space<vmem>>, vector<1x128xf32>
    %104 = vector.shape_cast %103 : vector<1x128xf32> to vector<1x1x128xf32>
    %105 = vector.broadcast %104 : vector<1x1x128xf32> to vector<8x16x128xf32>
    %106 = arith.addf %102, %105 : vector<8x16x128xf32>
    %cst_28 = arith.constant 5.000000e-01 : f32
    %107 = vector.broadcast %cst_28 : f32 to vector<8x16x128xf32>
    %108 = arith.mulf %107, %106 : vector<8x16x128xf32>
    %109 = arith.mulf %106, %106 : vector<8x16x128xf32>
    %110 = arith.mulf %109, %106 : vector<8x16x128xf32>
    %cst_29 = arith.constant 4.471500e-02 : f32
    %111 = vector.broadcast %cst_29 : f32 to vector<8x16x128xf32>
    %112 = arith.mulf %111, %110 : vector<8x16x128xf32>
    %113 = arith.addf %106, %112 : vector<8x16x128xf32>
    %cst_30 = arith.constant 0.797884583 : f32
    %114 = vector.broadcast %cst_30 : f32 to vector<8x16x128xf32>
    %115 = arith.mulf %114, %113 : vector<8x16x128xf32>
    %116 = math.tanh %115 : vector<8x16x128xf32>
    %cst_31 = arith.constant 1.000000e+00 : f32
    %117 = vector.broadcast %cst_31 : f32 to vector<8x16x128xf32>
    %118 = arith.addf %117, %116 : vector<8x16x128xf32>
    %119 = arith.mulf %108, %118 : vector<8x16x128xf32>
    %120 = arith.truncf %119 : vector<8x16x128xf32> to vector<8x16x128xbf16>
    %c0_32 = arith.constant 0 : index
    %c0_33 = arith.constant 0 : index
    %c0_34 = arith.constant 0 : index
    %c0_35 = arith.constant 0 : index
    %121 = vector.load %arg7[%c0_32, %c0_33, %c0_34, %c0_35] : memref<1x8x16x128xbf16, #tpu.memory_space<vmem>>, vector<1x8x16x128xbf16>
    %122 = vector.shape_cast %121 : vector<1x8x16x128xbf16> to vector<8x16x128xbf16>
    %123 = vector.shape_cast %120 : vector<8x16x128xbf16> to vector<1x8x16x128xbf16>
    tpu.vector_store %arg7[%c0_32, %c0_33, %c0_34, %c0_35], %123 {strides = array<i32>} : memref<1x8x16x128xbf16, #tpu.memory_space<vmem>>, vector<1x8x16x128xbf16>,
    %c0_i32_36 = arith.constant 0 : i32
    %124 = arith.cmpi eq, %arg1, %c0_i32_36 : i32
    %125 = arith.extui %124 : i1 to i32
    %c0_i32_37 = arith.constant 0 : i32
    %126 = arith.cmpi ne, %125, %c0_i32_37 : i32
    scf.if %126 {
      %cst_45 = arith.constant 0.000000e+00 : f32
      %133 = vector.broadcast %cst_45 : f32 to vector<1x8x128xf32>
      %c0_46 = arith.constant 0 : index
      %c0_47 = arith.constant 0 : index
      %c0_48 = arith.constant 0 : index
      %134 = vector.load %arg8[%c0_46, %c0_47, %c0_48] : memref<1x8x128xf32, #tpu.memory_space<vmem>>, vector<1x8x128xf32>
      tpu.vector_store %arg8[%c0_46, %c0_47, %c0_48], %133 {strides = array<i32>} : memref<1x8x128xf32, #tpu.memory_space<vmem>>, vector<1x8x128xf32>,
    } else {
    }
    %c0_38 = arith.constant 0 : index
    %c0_39 = arith.constant 0 : index
    %c0_40 = arith.constant 0 : index
    %127 = vector.load %arg8[%c0_38, %c0_39, %c0_40] : memref<1x8x128xf32, #tpu.memory_space<vmem>>, vector<1x8x128xf32>
    %cst_41 = arith.constant dense<0.000000e+00> : vector<128xf32>
    %128 = vector.multi_reduction <add>, %119, %cst_41 [0, 1] : vector<8x16x128xf32> to vector<128xf32>
    %129 = vector.shape_cast %128 : vector<128xf32> to vector<1x1x128xf32>
    %130 = vector.broadcast %129 : vector<1x1x128xf32> to vector<1x8x128xf32>
    %131 = arith.addf %127, %130 : vector<1x8x128xf32>
    %c0_42 = arith.constant 0 : index
    %c0_43 = arith.constant 0 : index
    %c0_44 = arith.constant 0 : index
    %132 = vector.load %arg8[%c0_42, %c0_43, %c0_44] : memref<1x8x128xf32, #tpu.memory_space<vmem>>, vector<1x8x128xf32>
    tpu.vector_store %arg8[%c0_42, %c0_43, %c0_44], %131 {strides = array<i32>} : memref<1x8x128xf32, #tpu.memory_space<vmem>>, vector<1x8x128xf32>,
    return
  }
  func.func @transform_0(%arg0: i32, %arg1: i32) -> (i32, i32, i32, i32) {
    %c0_i32 = arith.constant 0 : i32
    %c0_i32_0 = arith.constant 0 : i32
    %c0_i32_1 = arith.constant 0 : i32
    %c0_i32_2 = arith.constant 0 : i32
    return %arg0, %c0_i32, %c0_i32_0, %c0_i32_1 : i32, i32, i32, i32
  }
  func.func @transform_1(%arg0: i32, %arg1: i32) -> (i32, i32) {
    %c0_i32 = arith.constant 0 : i32
    %c0_i32_0 = arith.constant 0 : i32
    %c0_i32_1 = arith.constant 0 : i32
    return %c0_i32, %c0_i32_0 : i32, i32
  }
  func.func @transform_2(%arg0: i32, %arg1: i32) -> (i32, i32) {
    %c0_i32 = arith.constant 0 : i32
    %c0_i32_0 = arith.constant 0 : i32
    %c0_i32_1 = arith.constant 0 : i32
    return %c0_i32, %c0_i32_0 : i32, i32
  }
  func.func @transform_3(%arg0: i32, %arg1: i32) -> (i32, i32) {
    %c0_i32 = arith.constant 0 : i32
    %c0_i32_0 = arith.constant 0 : i32
    %c0_i32_1 = arith.constant 0 : i32
    return %c0_i32, %c0_i32_0 : i32, i32
  }
  func.func @transform_4(%arg0: i32, %arg1: i32) -> (i32, i32) {
    %c0_i32 = arith.constant 0 : i32
    %c0_i32_0 = arith.constant 0 : i32
    %c0_i32_1 = arith.constant 0 : i32
    return %c0_i32, %c0_i32_0 : i32, i32
  }
  func.func @transform_5(%arg0: i32, %arg1: i32) -> (i32, i32, i32, i32) {
    %c0_i32 = arith.constant 0 : i32
    %c0_i32_0 = arith.constant 0 : i32
    %c0_i32_1 = arith.constant 0 : i32
    return %arg0, %arg1, %c0_i32, %c0_i32_0 : i32, i32, i32, i32
  }
  func.func @transform_6(%arg0: i32, %arg1: i32) -> (i32, i32, i32) {
    %c0_i32 = arith.constant 0 : i32
    %c0_i32_0 = arith.constant 0 : i32
    %c0_i32_1 = arith.constant 0 : i32
    return %arg0, %c0_i32, %c0_i32_0 : i32, i32, i32
  }
}

module attributes {stable_mosaic.version = 11 : i64} {
  func.func @_mbconv_stage2_kernel(%arg0: i32, %arg1: i32, %arg2: memref<1x8x16x128xbf16, #tpu.memory_space<vmem>>, %arg3: memref<1x128x64xbf16, #tpu.memory_space<vmem>>, %arg4: memref<1x64xf32, #tpu.memory_space<vmem>>, %arg5: memref<1x8x16x64xf32, #tpu.memory_space<vmem>>) attributes {dimension_semantics = [#tpu.dimension_semantics<parallel>, #tpu.dimension_semantics<parallel>], iteration_bounds = array<i64: 2, 2>, scalar_prefetch = 0 : i64, scratch_operands = 0 : i64, tpu.core_type = #tpu.core_type<tc>, window_params = [{transform_indices = @transform_0, window_bounds = array<i64: 1, 8, 16, 128>}, {transform_indices = @transform_1, window_bounds = array<i64: 1, 128, 64>}, {pipeline_mode = #tpu.pipeline_mode<synchronous>, transform_indices = @transform_2, window_bounds = array<i64: 1, 64>}, {transform_indices = @transform_3, window_bounds = array<i64: 1, 8, 16, 64>}]} {
    %c0 = arith.constant 0 : index
    %c0_0 = arith.constant 0 : index
    %c0_1 = arith.constant 0 : index
    %c0_2 = arith.constant 0 : index
    %0 = vector.load %arg2[%c0, %c0_0, %c0_1, %c0_2] : memref<1x8x16x128xbf16, #tpu.memory_space<vmem>>, vector<1x8x16x128xbf16>
    %1 = vector.shape_cast %0 : vector<1x8x16x128xbf16> to vector<8x16x128xbf16>
    %2 = vector.shape_cast %1 : vector<8x16x128xbf16> to vector<128x128xbf16>
    %c0_3 = arith.constant 0 : index
    %c0_4 = arith.constant 0 : index
    %c0_5 = arith.constant 0 : index
    %3 = vector.load %arg3[%c0_3, %c0_4, %c0_5] : memref<1x128x64xbf16, #tpu.memory_space<vmem>>, vector<1x128x64xbf16>
    %4 = vector.shape_cast %3 : vector<1x128x64xbf16> to vector<128x64xbf16>
    %cst = arith.constant dense<0.000000e+00> : vector<128x64xf32>
    %5 = tpu.matmul %2, %4, %cst {dimension_numbers = #tpu.dot_dimension_numbers<[1], [0], [0], [1], [0, 0, 1, 1], [], []>} : vector<128x128xbf16>, vector<128x64xbf16>, vector<128x64xf32> -> vector<128x64xf32>
    %c0_6 = arith.constant 0 : index
    %c0_7 = arith.constant 0 : index
    %6 = vector.load %arg4[%c0_6, %c0_7] : memref<1x64xf32, #tpu.memory_space<vmem>>, vector<1x64xf32>
    %7 = vector.broadcast %6 : vector<1x64xf32> to vector<128x64xf32>
    %8 = arith.addf %5, %7 : vector<128x64xf32>
    %9 = vector.shape_cast %8 : vector<128x64xf32> to vector<8x16x64xf32>
    %c0_8 = arith.constant 0 : index
    %c0_9 = arith.constant 0 : index
    %c0_10 = arith.constant 0 : index
    %c0_11 = arith.constant 0 : index
    %10 = vector.load %arg5[%c0_8, %c0_9, %c0_10, %c0_11] : memref<1x8x16x64xf32, #tpu.memory_space<vmem>>, vector<1x8x16x64xf32>
    %11 = vector.shape_cast %10 : vector<1x8x16x64xf32> to vector<8x16x64xf32>
    %12 = vector.shape_cast %9 : vector<8x16x64xf32> to vector<1x8x16x64xf32>
    tpu.vector_store %arg5[%c0_8, %c0_9, %c0_10, %c0_11], %12 {strides = array<i32>} : memref<1x8x16x64xf32, #tpu.memory_space<vmem>>, vector<1x8x16x64xf32>,
    return
  }
  func.func @transform_0(%arg0: i32, %arg1: i32) -> (i32, i32, i32, i32) {
    %c0_i32 = arith.constant 0 : i32
    %c0_i32_0 = arith.constant 0 : i32
    %c0_i32_1 = arith.constant 0 : i32
    return %arg0, %arg1, %c0_i32, %c0_i32_0 : i32, i32, i32, i32
  }
  func.func @transform_1(%arg0: i32, %arg1: i32) -> (i32, i32, i32) {
    %c0_i32 = arith.constant 0 : i32
    %c0_i32_0 = arith.constant 0 : i32
    %c0_i32_1 = arith.constant 0 : i32
    return %arg0, %c0_i32, %c0_i32_0 : i32, i32, i32
  }
  func.func @transform_2(%arg0: i32, %arg1: i32) -> (i32, i32) {
    %c0_i32 = arith.constant 0 : i32
    %c0_i32_0 = arith.constant 0 : i32
    %c0_i32_1 = arith.constant 0 : i32
    return %c0_i32, %c0_i32_0 : i32, i32
  }
  func.func @transform_3(%arg0: i32, %arg1: i32) -> (i32, i32, i32, i32) {
    %c0_i32 = arith.constant 0 : i32
    %c0_i32_0 = arith.constant 0 : i32
    %c0_i32_1 = arith.constant 0 : i32
    return %arg0, %arg1, %c0_i32, %c0_i32_0 : i32, i32, i32, i32
  }
}

</mosaic_0001>

<bundles_post_ra>
// kernel: mbconv_forward.3
= control target key start
LH: loop header
LB: loop body
LE: loop exit
PB: predicated region body
PF: predicated region fallthrough
CT: control target
= control target key end

     0   :  { %8 = vsyncpa [#allocation3], 0  ;;  %s1034_s0 = inlined_call_operand.vmem [shape: bf16[2,16,16,128], index: 0, kind: input, shape index: {}]   ;;  %s1035_s1 = inlined_call_operand.vmem [shape: bf16[2,128,64], index: 1, kind: input, shape index: {}]   ;;  %s1036_s2 = inlined_call_operand.vmem [shape: f32[1,64], index: 2, kind: input, shape index: {}]   ;;  %s1037_s3 = inlined_call_operand.hbm [shape: f32[2,16,16,64], index: 3, kind: output, shape index: {}]  }
   0x1   :  { %10 = vsyncpa [#allocation3 + $0x1], 0  ;;  %s854_s12 = smov 0   ;;  %s856_s13 = smov 0  }
   0x2   :  { %s858_s14 = smov 0   ;;  %s860_s15 = smov 0  }
   0x3   :  { %s862_s16 = smov 0   ;;  %s864_s17 = smov 0  }
   0x4   :  { %s866_s18 = smov 0   ;;  %s868_s19 = smov 0  }
   0x5 LB: > { %s537_s20 = sadd.s32 4294967295, %s830_s19   ;;  %s538_s21 = sadd.s32 4294967294, %s830_s19   ;;  %s830_s19 = sphi %s868_s19, %s16_s19   ;;  %s826_s18 = sphi %s866_s18, %s1046_s18   ;;  %s822_s17 = sphi %s864_s17, %s1045_s17   ;;  %s818_s16 = sphi %s862_s16, %s1044_s16   ;;  %s814_s15 = sphi %s860_s15, %s1043_s15   ;;  %s810_s14 = sphi %s858_s14, %s1042_s14   ;;  %s806_s13 = sphi %s856_s13, %s1041_s13   ;;  %s802_s12 = sphi %s854_s12, %s1040_s12  }
   0x6   : > { %s25_s22 = sadd.s32 1, %s822_s17  ;;  %s28_s23 = sadd.s32 1, %s826_s18 }
   0x7   : > { %p26_p0 = scmp.ge.s32.totalorder %s25_s22, 2  ;;  %p122_p1 = scmp.ne.s32.totalorder %s810_s14, %s806_s13 }
   0x8   : > { %p123_p2 = scmp.eq.s32.totalorder %s537_s20, 3  ;;  %p128_p5 = scmp.ne.s32.totalorder %s806_s13, %s802_s12 }
   0x9   : > { %s1048_s22 = smov (%p26_p0, %s25_s22), 0  ;;  %s1050_s23 = smov (!%p26_p0, %s28_s23), %s826_s18 }
   0xa   : > { %s108_s24 = ssub.s32 %s822_s17, %s1048_s22  ;;  %p905_p3 = por %p123_p2, %p122_p1 }
   0xb   : > { %p30_p4 = scmp.ge.s32.totalorder %s1050_s23, 2  ;;  %p129_p6 = scmp.eq.s32.totalorder %s538_s21, 3 }
   0xc   : > { %p541_p7 = scmp.ge.s32.totalorder %s830_s19, 1  ;;  %p172_p9 = scmp.lt.s32.totalorder %s830_s19, 5 }
   0xd   : > { %s1052_s23 = smov (%p30_p4, %s1050_s23), 0  ;;  %p914_p8 = por %p129_p6, %p128_p5 }
   0xe   : > { %s107_s27 = ssub.s32 %s826_s18, %s1052_s23  ;;  %s112_s28 = sadd.s32 1, %s810_s14 }
   0xf   : > { %s109_s29 = sor.u32 %s108_s24, %s107_s27  ;;  %p173_p10 = pnand %p541_p7, %p172_p9 }
  0x10   : > { %p110_p11 = scmp.eq.s32.totalorder %s109_s29, 0  ;;  %p207_p12 = scmp.lt.s32.totalorder (!%p173_p10), %s818_s16, 1 }
  0x11   : > { %176 = sbr.rel (%p173_p10) target bundleno = 222 (0xde), region = 32  ;;  %s543_s9 = sshll.u32 (!%p173_p10), %s814_s15, 3 }
  0x12   : > { %s923_s30 = scalar_select %p110_p11, %s810_s14, %s112_s28  }
  0x13   : > { %p209_p13 = scmp.lt.s32.totalorder (!%p173_p10), %s543_s9, 15  ;;  %s203_s29 = sand.u32 (!%p173_p10), 1, %s806_s13  }
  0x14   : > { %s422_s27 = scalar_lea.sflag (!%p173_p10), [#allocation3], %s203_s29 }
  0x16   : > { %s927_s4 = scalar_select %p207_p12, %s818_s16, 1  ;;  %v735_v16 = vld [vmem:[%s1036_s2] ss:$0 sm:$0xff]  ;;  %vm404_vm0 = vcmask 523264  }
  0x17   : > { %s1054_s9 = smov (!%p209_p13, %s543_s9), 15 }
  0x18   : > { %s620_s5 = sshll.u32 %s927_s4, 6  ;;  %s544_s10 = sshll.u32 %s1054_s9, 1 }
  0x19   : > { %s933_s8 = scalar_lea.vmem %s1035_s1, %s620_s5  ;;  %s545_s11 = sshll.u32 %s927_s4, 5 }
  0x1a   : > { %v636_v0 = vld [vmem:[%s933_s8 + $0x38] sm:$0xff]  ;;  %v635_v1 = vld [vmem:[%s933_s8 + $0x30] sm:$0xff]  ;;  %v634_v2 = vld [vmem:[%s933_s8 + $0x28] sm:$0xff]  ;;  %s213_s20 = sadd.s32 %s545_s11, %s544_s10  ;;  %s542_s4 = sshll.u32 %s203_s29, 7 }
  0x1b   : > { %355 = vmatpush.bf16.msra.mxu0 %v636_v0  ;;  %638 = vmatpush.bf16.msra.mxu1 %v636_v0  ;;  %v633_v3 = vld [vmem:[%s933_s8 + $0x20] sm:$0xff]  ;;  %v632_v4 = vld [vmem:[%s933_s8 + $0x18] sm:$0xff]  ;;  %v631_v5 = vld [vmem:[%s933_s8 + $0x10] sm:$0xff]  ;;  %s546_s21 = sshll.u32 %s213_s20, 2  ;;  %s954_s7 = scalar_lea.vmem [#allocation2], %s542_s4 }
  0x1c   : > { %639 = vmatpush.bf16.msra.mxu2 %v636_v0  ;;  %640 = vmatpush.bf16.msra.mxu3 %v636_v0  ;;  %v630_v6 = vld [vmem:[%s933_s8 + $0x8] sm:$0xff]  ;;  %v629_v7 = vld [vmem:[%s933_s8] sm:$0xff]  ;;  %s215_s28 = scalar_lea.vmem %s1034_s0, %s546_s21  ;;  %s637_s8 = sshll.u32 %s814_s15, 4 }
  0x1d   : > { %v621_v8 = vld [vmem:[%s215_s28] sm:$0xff]  ;;  %v623_v9 = vld [vmem:[%s215_s28 + $0x10] sm:$0xff]  ;;  %v622_v12 = vld [vmem:[%s215_s28 + $0x8] sm:$0xff]  ;;  %s616_s9 = sshll.u32 %s818_s16, 5  ;;  %s437_s21 = sshll.u32 %s954_s7, 4  ;;  %s438_s21 = int_to_ptr.vmem [resolvable:$true] %s437_s21 }
  0x1e   : > { %v625_v10 = vld [vmem:[%s215_s28 + $0x20] sm:$0xff]  ;;  %v627_v11 = vld [vmem:[%s215_s28 + $0x30] sm:$0xff]  ;;  %v624_v13 = vld [vmem:[%s215_s28 + $0x18] sm:$0xff]  ;;  %s434_s10 = sadd.s32 %s637_s8, %s616_s9  ;;  %s756_s8 = scalar_lea.hbm %s1037_s3, 512 }
  0x1f   : > { %356 = vmatpush.bf16.msra.mxu0 %v635_v1  ;;  %641 = vmatpush.bf16.msra.mxu1 %v635_v1  ;;  %v626_v14 = vld [vmem:[%s215_s28 + $0x28] sm:$0xff]  ;;  %v628_v15 = vld [vmem:[%s215_s28 + $0x38] sm:$0xff]  ;;  %s617_s11 = sshll.u32 %s434_s10, 3 }
  0x20   : > { %642 = vmatpush.bf16.msra.mxu2 %v635_v1  ;;  %643 = vmatpush.bf16.msra.mxu3 %v635_v1  ;;  %s436_s20 = scalar_lea.hbm %s1037_s3, %s617_s11 }
  0x21   : > { %s439_s24 = sshll.u32 %s436_s20, 4  ;;  %s440_s24 = int_to_ptr.hbm [resolvable:$true] %s439_s24 }
  0x22   : > { %s750_s28 = sshra.s32 %s440_s24, 4  ;;  %s751_s28 = int_to_ptr.hbm [resolvable:$true] %s750_s28 }
  0x23   : > { %357 = vmatpush.bf16.msra.mxu0 %v634_v2  ;;  %644 = vmatpush.bf16.msra.mxu1 %v634_v2  ;;  %s752_s4 = scalar_lea.hbm %s751_s28, 128  ;;  %p757_p4 = scmp.lt.s32.totalorder %s751_s28, %s1037_s3 }
  0x24   : > { %645 = vmatpush.bf16.msra.mxu2 %v634_v2  ;;  %646 = vmatpush.bf16.msra.mxu3 %v634_v2  ;;  %p753_p0 = scmp.ne.s32.totalorder %s751_s28, %s752_s4  ;;  %p758_p5 = scmp.lt.s32.totalorder %s756_s8, %s752_s4 }
  0x26   : > { %p754_p1 = pnand %p753_p0, %p905_p3  ;;  %p759_p6 = por %p758_p5, %p757_p4 }
  0x27   : > { %358 = vmatpush.bf16.msra.mxu0 %v633_v3  ;;  %647 = vmatpush.bf16.msra.mxu1 %v633_v3 }
  0x28   : > { %648 = vmatpush.bf16.msra.mxu2 %v633_v3  ;;  %649 = vmatpush.bf16.msra.mxu3 %v633_v3  ;;  %p755_p2 = pneg %p754_p1 }
  0x2a   : > { %p760_p7 = pnand %p759_p6, %p755_p2 }
  0x2b   : > { %359 = vmatpush.bf16.msra.mxu0 %v632_v4  ;;  %650 = vmatpush.bf16.msra.mxu1 %v632_v4 }
  0x2c   : > { %651 = vmatpush.bf16.msra.mxu2 %v632_v4  ;;  %652 = vmatpush.bf16.msra.mxu3 %v632_v4 }
  0x2f   : > { %360 = vmatpush.bf16.msra.mxu0 %v631_v5  ;;  %653 = vmatpush.bf16.msra.mxu1 %v631_v5 }
  0x30   : > { %654 = vmatpush.bf16.msra.mxu2 %v631_v5  ;;  %655 = vmatpush.bf16.msra.mxu3 %v631_v5 }
  0x33   : > { %361 = vmatpush.bf16.msra.mxu0 %v630_v6  ;;  %656 = vmatpush.bf16.msra.mxu1 %v630_v6 }
  0x34   : > { %657 = vmatpush.bf16.msra.mxu2 %v630_v6  ;;  %658 = vmatpush.bf16.msra.mxu3 %v630_v6 }
  0x37   : > { %362 = vmatpush.bf16.msra.mxu0 %v629_v7  ;;  %659 = vmatpush.bf16.msra.mxu1 %v629_v7 }
  0x38   : > { %660 = vmatpush.bf16.msra.mxu2 %v629_v7  ;;  %661 = vmatpush.bf16.msra.mxu3 %v629_v7 }
  0x3a   : > { %363 = vmatmul.bf16.vlgmr.msra.gmra.mxu0 %v621_v8  ;;  %373 = vmatmul.bf16.vlgmr.msra.gmra.mxu1 %v623_v9 }
  0x3b   : > { %383 = vmatmul.bf16.vlgmr.msra.gmra.mxu2 %v625_v10  ;;  %393 = vmatmul.bf16.vlgmr.msra.gmra.mxu3 %v627_v11 }
  0x4a   : > { %368 = vmatmul.bf16.gmra.mxu0 %v622_v12  ;;  %378 = vmatmul.bf16.gmra.mxu1 %v624_v13 }
  0x4b   : > { %388 = vmatmul.bf16.gmra.mxu2 %v626_v14  ;;  %398 = vmatmul.bf16.gmra.mxu3 %v628_v15 }
  0xb7   : > { %v364_v17 = vpop.f32.mrf.mxu0  ;;  %v374_v18 = vpop.f32.mrf.mxu1 }
  0xb8   : > { %v365_v19 = vadd.f32 %v735_v16, %v364_v17  ;;  %v375_v20 = vadd.f32 %v735_v16, %v374_v18 }
  0xba   : > { %405 = vst.msk [vmem:[%s954_s7] sm:$0xff] %vm404_vm0, %v365_v19 }
  0xbb   : > { %409 = vst.msk [vmem:[%s954_s7 + $0x20] sm:$0xff] %vm404_vm0, %v375_v20 }
  0xbe   : > { %v384_v21 = vpop.f32.mrf.mxu2  ;;  %v394_v22 = vpop.f32.mrf.mxu3 }
  0xbf   : > { %v385_v23 = vadd.f32 %v735_v16, %v384_v21  ;;  %v395_v24 = vadd.f32 %v735_v16, %v394_v22  ;;  %v366_v25 = vpop.f32.mrf.mxu0  ;;  %v376_v26 = vpop.f32.mrf.mxu1 }
  0xc0   : > { %v367_v27 = vadd.f32 %v735_v16, %v366_v25  ;;  %v377_v28 = vadd.f32 %v735_v16, %v376_v26 }
  0xc1   : > { %413 = vst.msk [vmem:[%s954_s7 + $0x40] sm:$0xff] %vm404_vm0, %v385_v23 }
  0xc2   : > { %417 = vst.msk [vmem:[%s954_s7 + $0x60] sm:$0xff] %vm404_vm0, %v395_v24 }
  0xc3   : > { %406 = vst.msk [vmem:[%s954_s7 + $0x8] sm:$0xff] %vm404_vm0, %v367_v27 }
  0xc4   : > { %410 = vst.msk [vmem:[%s954_s7 + $0x28] sm:$0xff] %vm404_vm0, %v377_v28 }
  0xc6   : > { %v386_v29 = vpop.f32.mrf.mxu2  ;;  %v396_v30 = vpop.f32.mrf.mxu3 }
  0xc7   : > { %v387_v31 = vadd.f32 %v735_v16, %v386_v29  ;;  %v397_v32 = vadd.f32 %v735_v16, %v396_v30  ;;  %v369_v33 = vpop.f32.mrf.mxu0  ;;  %v379_v34 = vpop.f32.mrf.mxu1 }
  0xc8   : > { %v370_v35 = vadd.f32 %v735_v16, %v369_v33  ;;  %v380_v36 = vadd.f32 %v735_v16, %v379_v34 }
  0xc9   : > { %414 = vst.msk [vmem:[%s954_s7 + $0x48] sm:$0xff] %vm404_vm0, %v387_v31 }
  0xca   : > { %418 = vst.msk [vmem:[%s954_s7 + $0x68] sm:$0xff] %vm404_vm0, %v397_v32 }
  0xcb   : > { %407 = vst.msk [vmem:[%s954_s7 + $0x10] sm:$0xff] %vm404_vm0, %v370_v35 }
  0xcc   : > { %411 = vst.msk [vmem:[%s954_s7 + $0x30] sm:$0xff] %vm404_vm0, %v380_v36 }
  0xce   : > { %v389_v37 = vpop.f32.mrf.mxu2  ;;  %v399_v38 = vpop.f32.mrf.mxu3 }
  0xcf   : > { %v390_v39 = vadd.f32 %v735_v16, %v389_v37  ;;  %v400_v40 = vadd.f32 %v735_v16, %v399_v38  ;;  %v371_v41 = vpop.f32.mrf.mxu0  ;;  %v381_v42 = vpop.f32.mrf.mxu1 }
  0xd0   : > { %v372_v43 = vadd.f32 %v735_v16, %v371_v41  ;;  %v382_v44 = vadd.f32 %v735_v16, %v381_v42 }
  0xd1   : > { %415 = vst.msk [vmem:[%s954_s7 + $0x50] sm:$0xff] %vm404_vm0, %v390_v39 }
  0xd2   : > { %419 = vst.msk [vmem:[%s954_s7 + $0x70] sm:$0xff] %vm404_vm0, %v400_v40 }
  0xd3   : > { %408 = vst.msk [vmem:[%s954_s7 + $0x18] sm:$0xff] %vm404_vm0, %v372_v43 }
  0xd4   : > { %412 = vst.msk [vmem:[%s954_s7 + $0x38] sm:$0xff] %vm404_vm0, %v382_v44 }
  0xd6   : > { %v391_v45 = vpop.f32.mrf.mxu2  ;;  %v401_v46 = vpop.f32.mrf.mxu3 }
  0xd7   : > { %v392_v47 = vadd.f32 %v735_v16, %v391_v45  ;;  %v402_v48 = vadd.f32 %v735_v16, %v401_v46 }
  0xd9   : > { %416 = vst.msk [vmem:[%s954_s7 + $0x58] sm:$0xff] %vm404_vm0, %v392_v47 }
  0xda   : > { %420 = vst.msk [vmem:[%s954_s7 + $0x78] sm:$0xff] %vm404_vm0, %v402_v48 }
  0xdb   : > { %763 = shalt.err (!%p760_p7)
}
  0xdc   : > { %s832_s29 = smov 128   ;;  %s833_s7 = smov 8  }
  0xdd   : > { %662 = dma.vmem_to_hbm [thread:$0]  (%p905_p3), %s438_s21, 2048, %s440_s24, %s422_s27, %s832_s29, %s832_s29, %s833_s7  }
  0xde PF: > { %p668_p9 = scmp.ge.s32.totalorder %s830_s19, 2  ;;  %s454_s11 = sand.u32 1, %s802_s12  }
  0xdf   : > { %s455_s15 = scalar_lea.sflag [#allocation3], %s454_s11 }
  0xe0   : > { %p665_p10 = pnand %p668_p9, %p914_p8 }
  0xe2   : > { %p666_p11 = pneg %p665_p10 }
  0xe4   : > { %797 = dma.done.wait (%p666_p11), %s455_s15, 2048  }
  0xe5   : > { %799 = vsyncadd (%p666_p11), %s455_s15, 4294965248  ;;  %s16_s19 = sadd.s32 1, %s830_s19   ;;  %s1040_s12 = smov %s806_s13 }
  0xe6   : > { %p13_p12 = scmp.ge.s32.totalorder %s16_s19, 6   ;;  %s1041_s13 = smov %s810_s14 }
  0xe7   : > { %s1042_s14 = smov %s923_s30  ;;  %s1043_s15 = smov %s822_s17 }
  0xe8   : > { %s1044_s16 = smov %s826_s18  ;;  %s1045_s17 = smov %s1048_s22 }
  0xe9   : > { %s1046_s18 = smov %s1052_s23  ;;  %15 = sbr.rel (!%p13_p12) target bundleno = 5 (0x5), region = 70 }
  0xee   :  { %461 = vsyncpa [#allocation3], 1 }
  0xef   :  { %463 = vsyncpa [#allocation3 + $0x1], 1 }

// kernel: mbconv_forward.2
= control target key start
LH: loop header
LB: loop body
LE: loop exit
PB: predicated region body
PF: predicated region fallthrough
CT: control target
= control target key end

     0   :  { %s2612_s21 = smov 0   ;;  %s2614_s22 = smov 0   ;;  %s4494_s0 = inlined_call_operand.vmem [shape: bf16[2,18,24,32], index: 0, kind: input, shape index: {}]   ;;  %s4495_s1 = inlined_call_operand.vmem [shape: bf16[32,128], index: 1, kind: input, shape index: {}]   ;;  %s4496_s2 = inlined_call_operand.vmem [shape: f32[1,128], index: 2, kind: input, shape index: {}]   ;;  %s4497_s3 = inlined_call_operand.vmem [shape: f32[9,128], index: 3, kind: input, shape index: {}]   ;;  %s4498_s4 = inlined_call_operand.vmem [shape: f32[1,128], index: 4, kind: input, shape index: {}]   ;;  %s4499_s5 = inlined_call_operand.vmem [shape: bf16[2,16,16,128], index: 5, kind: output, shape index: {0}]   ;;  %s4500_s6 = inlined_call_operand.vmem [shape: f32[2,8,128], index: 6, kind: output, shape index: {1}]  }
   0x1   :  { %s2616_s23 = smov 0   ;;  %s2618_s24 = smov 0  }
   0x2   :  { %s2620_s25 = smov 0  }
   0x3 LB: > { %s26_s26 = sadd.s32 1, %s2566_s23  ;;  %s29_s27 = sadd.s32 1, %s2570_s24  ;;  %s2574_s25 = sphi %s2620_s25, %s17_s25   ;;  %s2570_s24 = sphi %s2618_s24, %s4840_s24   ;;  %s2566_s23 = sphi %s2616_s23, %s4839_s23   ;;  %s2562_s22 = sphi %s2614_s22, %s4838_s22   ;;  %s2558_s21 = sphi %s2612_s21, %s4837_s21  }
   0x4   : > { %p27_p0 = scmp.ge.s32.totalorder %s26_s26, 2  ;;  %p2210_p1 = scmp.ge.s32.totalorder %s2574_s25, 1 }
   0x5   : > { %p229_p2 = scmp.lt.s32.totalorder %s2574_s25, 5 }
   0x6   : > { %s4842_s26 = smov (%p27_p0, %s26_s26), 0  ;;  %s4844_s27 = smov (!%p27_p0, %s29_s27), %s2570_s24 }
   0x7   : > { %p230_p3 = pnand %p2210_p1, %p229_p2  ;;  %p31_p4 = scmp.ge.s32.totalorder %s4844_s27, 2 }
   0x9   : > { %s4846_s27 = smov (%p31_p4, %s4844_s27), 0  ;;  %233 = sbr.rel (%p230_p3) target bundleno = 496 (0x1f0), region = 40 }
   0xe   : > { %v2327_v0 = vld [vmem:[%s4495_s1 + $0x8] sm:$0xff]  ;;  %p268_p5 = scmp.lt.s32.totalorder %s2562_s22, 1  ;;  %v2326_v1 = vld [vmem:[%s4495_s1] sm:$0xff]  ;;  %s2310_s8 = smul.u32 96, %s2558_s21  ;;  %vm418_vm0 = vcmask 261120   ;;  %v829_v27 = vlaneseq }
   0xf   : > { %470 = vmatpush.bf16.msra.mxu0 %v2327_v0  ;;  %2375 = vmatpush.bf16.msra.mxu1 %v2327_v0  ;;  %v2681_v17 = vld [vmem:[%s4496_s2] ss:$0 sm:$0xff]  ;;  %s2696_s20 = sshll.u32 %s2558_s21, 3  ;;  %p2307_p7 = scmp.ne.s32.totalorder %s2558_s21, 0 }
  0x10   : > { %s4848_s22 = smov (!%p268_p5, %s2562_s22), 1  ;;  %2376 = vmatpush.bf16.msra.mxu2 %v2327_v0  ;;  %2377 = vmatpush.bf16.msra.mxu3 %v2327_v0  ;;  %s2303_s28 = sadd.s32 4294967295, %s2696_s20  ;;  %v830_v42 = vshrl.u32 %v829_v27, 7 }
  0x11   : > { %s2381_s9 = smul.u32 216, %s4848_s22  ;;  %s2216_s10 = sshll.u32 %s4848_s22, 3  ;;  %v2723_v48 = vstv %s2303_s28 }
  0x12   : > { %s2658_s13 = scalar_lea.vmem %s4500_s6, %s2216_s10  ;;  %v832_v53 = vadd.s32 16, %v830_v42  ;;  %v821_v56 = vadd.s32 2, %v2723_v48  ;;  %vm836_vm1 = vcmp.ge.s32.totalorder %v2723_v48, 0  ;;  %vm846_vm2 = vcmp.lt.s32.totalorder %v2723_v48, 16  ;;  %p276_p6 = scmp.lt.s32.totalorder %s2696_s20, 15 }
  0x13   : > { %471 = vmatpush.bf16.msra.mxu0 %v2326_v1  ;;  %2378 = vmatpush.bf16.msra.mxu1 %v2326_v1  ;;  %s272_s16 = scalar_lea.vmem %s4494_s0, %s2381_s9  ;;  %vm2752_vm5 = vmand %vm836_vm1, %vm846_vm2 }
  0x14   : > { %2379 = vmatpush.bf16.msra.mxu2 %v2326_v1  ;;  %2380 = vmatpush.bf16.msra.mxu3 %v2326_v1  ;;  %s292_s17 = scalar_lea.vmem %s272_s16, %s2310_s8  ;;  %vm838_vm3 = vcmp.ge.s32.totalorder %v821_v56, 0  ;;  %vm848_vm4 = vcmp.lt.s32.totalorder %v821_v56, 16  ;;  %s4850_s20 = smov (!%p276_p6, %s2696_s20), 15 }
  0x15   : > { %v2311_v2 = vld [vmem:[%s292_s17] sm:$0xff]  ;;  %v2312_v6 = vld [vmem:[%s292_s17 + $0x8] sm:$0xff]  ;;  %v2313_v10 = vld [vmem:[%s292_s17 + $0x10] sm:$0xff]  ;;  %s2213_s16 = sshll.u32 %s4850_s20, 1 }
  0x16   : > { %v2315_v3 = vld [vmem:[%s292_s17 + $0x20] sm:$0xff]  ;;  %2288 = vmatmul.msk.bf16.vlgmr.msra.gmra.mxu0 %vm418_vm0, %v2311_v2  ;;  %v2316_v7 = vld [vmem:[%s292_s17 + $0x28] sm:$0xff]  ;;  %v2317_v11 = vld [vmem:[%s292_s17 + $0x30] sm:$0xff]  ;;  %v2735_v2 = vadd.s32 4294967295, %v830_v42 }
  0x17   : > { %v2319_v4 = vld [vmem:[%s292_s17 + $0x40] sm:$0xff]  ;;  %2292 = vmatmul.msk.bf16.vlgmr.msra.gmra.mxu1 %vm418_vm0, %v2315_v3  ;;  %v2320_v8 = vld [vmem:[%s292_s17 + $0x48] sm:$0xff]  ;;  %v2321_v12 = vld [vmem:[%s292_s17 + $0x50] sm:$0xff]  ;;  %v2738_v3 = vadd.s32 4294967295, %v832_v53 }
  0x18   : > { %v2323_v5 = vld [vmem:[%s292_s17 + $0x60] sm:$0xff]  ;;  %2296 = vmatmul.msk.bf16.vlgmr.msra.gmra.mxu2 %vm418_vm0, %v2319_v4  ;;  %v2324_v9 = vld [vmem:[%s292_s17 + $0x68] sm:$0xff]  ;;  %v2325_v13 = vld [vmem:[%s292_s17 + $0x70] sm:$0xff]  ;;  %4547 = vst [vmem:[#allocation2_spill] sm:$0xff] %v2735_v2  ;;  %vm866_vm6 = vcmp.ge.s32.totalorder %v2735_v2, 0 }
  0x19   : > { %2300 = vmatmul.msk.bf16.vlgmr.msra.gmra.mxu3 %vm418_vm0, %v2323_v5  ;;  %v2314_v14 = vld [vmem:[%s292_s17 + $0x18] sm:$0xff]  ;;  %4548 = vst [vmem:[#allocation3_spill] sm:$0xff] %v2738_v3  ;;  %vm2764_vm7 = vmand %vm838_vm3, %vm848_vm4  ;;  %vm901_vm8 = vcmp.lt.s32.totalorder %v2738_v3, 16  ;;  %v2813_v42 = vld [vmem:[%s4497_s3] ss:$0 sm:$0xff]  ;;  %vm1106_vm4 = vcmask 1046528  }
  0x1a   : > { %v2318_v15 = vld [vmem:[%s292_s17 + $0x38] sm:$0xff]  ;;  %vm2778_vm9 = vmand %vm2752_vm5, %vm866_vm6 }
  0x1b   : > { %v2322_v16 = vld [vmem:[%s292_s17 + $0x58] sm:$0xff]  ;;  %vm2794_vm10 = vmand %vm2764_vm7, %vm901_vm8  ;;  %s2214_s17 = sshll.u32 %s4848_s22, 5 }
  0x1c   : > { %s4311_s22 = sadd.s32 %s2214_s17, %s2213_s16 }
  0x1d   : > { %s2215_s20 = sshll.u32 %s4311_s22, 2 }
  0x1e   : > { %s4349_s28 = scalar_lea.vmem %s4499_s5, %s2215_s20 }
  0x26   : > { %2289 = vmatmul.msk.bf16.gmra.mxu0 %vm418_vm0, %v2312_v6 }
  0x27   : > { %2293 = vmatmul.msk.bf16.gmra.mxu1 %vm418_vm0, %v2316_v7 }
  0x28   : > { %2297 = vmatmul.msk.bf16.gmra.mxu2 %vm418_vm0, %v2320_v8 }
  0x29   : > { %2301 = vmatmul.msk.bf16.gmra.mxu3 %vm418_vm0, %v2324_v9 }
  0x36   : > { %2290 = vmatmul.msk.bf16.gmra.mxu0 %vm418_vm0, %v2313_v10 }
  0x37   : > { %2294 = vmatmul.msk.bf16.gmra.mxu1 %vm418_vm0, %v2317_v11 }
  0x38   : > { %2298 = vmatmul.msk.bf16.gmra.mxu2 %vm418_vm0, %v2321_v12 }
  0x39   : > { %2302 = vmatmul.msk.bf16.gmra.mxu3 %vm418_vm0, %v2325_v13 }
  0x46   : > { %2291 = vmatmul.msk.bf16.gmra.mxu0 %vm418_vm0, %v2314_v14 }
  0x47   : > { %2295 = vmatmul.msk.bf16.gmra.mxu1 %vm418_vm0, %v2318_v15 }
  0x48   : > { %2299 = vmatmul.msk.bf16.gmra.mxu2 %vm418_vm0, %v2322_v16  ;;  %v827_v16 = vadd.s32 8, %v2723_v48 }
  0x4a   : > { %vm844_vm11 = vcmp.ge.s32.totalorder %v827_v16, 0  ;;  %vm854_vm14 = vcmp.lt.s32.totalorder %v827_v16, 16 }
  0x4b   : > { %vm2836_vm1 = vmand %vm844_vm11, %vm854_vm14 }
  0x4c   : > { %vm2879_vm2 = vmand %vm2836_vm1, %vm866_vm6 }
  0x93   : > { %v473_v18 = vpop.f32.mrf.mxu0 }
  0x94   : > { %v493_v19 = vpop.f32.mrf.mxu1  ;;  %v2684_v20 = vadd.f32 %v2681_v17, %v473_v18  ;;  %v2759_v18 = vadd.s32 3, %v2723_v48 }
  0x95   : > { %v2687_v21 = vadd.f32 %v2681_v17, %v493_v19 }
  0x96   : > { %v578_v22 = vmul.f32 %v2684_v20, %v2684_v20  ;;  %v548_v14 = vmul.f32 0.5, %v2684_v20  ;;  %vm839_vm12 = vcmp.ge.s32.totalorder %v2759_v18, 0  ;;  %vm849_vm13 = vcmp.lt.s32.totalorder %v2759_v18, 16 }
  0x97   : > { %v586_v23 = vmul.f32 %v2687_v21, %v2687_v21  ;;  %v556_v19 = vmul.f32 0.5, %v2687_v21  ;;  %vm2899_vm3 = vmand %vm839_vm12, %vm849_vm13 }
  0x98   : > { %v608_v24 = vmul.f32 %v578_v22, %v2684_v20  ;;  %v4551_v22 = vmov 0  ;;  %vm904_vm13 = vmand %vm2752_vm5, %vm901_vm8 }
  0x99   : > { %v616_v25 = vmul.f32 %v586_v23, %v2687_v21  ;;  %v4552_v22 = vsel %vm2764_vm7, 4294967295, %v4551_v22  ;;  %v2770_v23 = vadd.s32 5, %v2723_v48 }
  0x9a   : > { %v638_v26 = vmul.f32 0.044715, %v608_v24  ;;  %4553 = vst [vmem:[#allocation4_spill] sm:$0xff] %v4552_v22 }
  0x9b   : > { %v646_v28 = vmul.f32 0.044715, %v616_v25  ;;  %v513_v29 = vpop.f32.mrf.mxu2  ;;  %v475_v33 = vpop.f32.mrf.mxu0  ;;  %vm841_vm15 = vcmp.ge.s32.totalorder %v2770_v23, 0  ;;  %vm851_vm0 = vcmp.lt.s32.totalorder %v2770_v23, 16 }
  0x9c   : > { %v533_v30 = vpop.f32.mrf.mxu3  ;;  %v2699_v31 = vadd.f32 %v2681_v17, %v513_v29  ;;  %v495_v34 = vpop.f32.mrf.mxu1  ;;  %v668_v35 = vadd.f32 %v638_v26, %v2684_v20  ;;  %v2707_v37 = vadd.f32 %v2681_v17, %v475_v33  ;;  %vm2938_vm11 = vmand %vm841_vm15, %vm851_vm0 }
  0x9d   : > { %v2702_v32 = vadd.f32 %v2681_v17, %v533_v30  ;;  %v676_v36 = vadd.f32 %v646_v28, %v2687_v21  ;;  %v2710_v38 = vadd.f32 %v2681_v17, %v495_v34  ;;  %v2788_v30 = vld [vmem:[%s4497_s3 + $0x1] ss:$0 sm:$0xff]  ;;  %vm919_vm12 = vmand %vm2938_vm11, %vm901_vm8 }
  0x9e   : > { %v594_v39 = vmul.f32 %v2699_v31, %v2699_v31  ;;  %v698_v41 = vmul.f32 0.7978846, %v668_v35  ;;  %v579_v44 = vmul.f32 %v2707_v37, %v2707_v37  ;;  %v2803_v35 = vld [vmem:[%s4497_s3 + $0x2] ss:$0 sm:$0xff] }
  0x9f   : > { %v602_v40 = vmul.f32 %v2702_v32, %v2702_v32  ;;  %v706_v43 = vmul.f32 0.7978846, %v676_v36  ;;  %v587_v47 = vmul.f32 %v2710_v38, %v2710_v38  ;;  %v564_v36 = vmul.f32 0.5, %v2699_v31 }
  0xa0   : > { %v624_v45 = vmul.f32 %v594_v39, %v2699_v31  ;;  %2434 = vtanh.f32 %v698_v41  ;;  %v609_v49 = vmul.f32 %v579_v44, %v2707_v37  ;;  %v572_v39 = vmul.f32 0.5, %v2702_v32 }
  0xa1   : > { %v632_v46 = vmul.f32 %v602_v40, %v2702_v32  ;;  %2436 = vtanh.f32 %v706_v43  ;;  %v617_v52 = vmul.f32 %v587_v47, %v2710_v38  ;;  %v549_v40 = vmul.f32 0.5, %v2707_v37 }
  0xa2   : > { %v654_v50 = vmul.f32 0.044715, %v624_v45  ;;  %v639_v54 = vmul.f32 0.044715, %v609_v49  ;;  %v2826_v45 = vld [vmem:[%s4497_s3 + $0x4] ss:$0 sm:$0xff] }
  0xa3   : > { %v662_v51 = vmul.f32 0.044715, %v632_v46  ;;  %v515_v55 = vpop.f32.mrf.mxu2  ;;  %v647_v58 = vmul.f32 0.044715, %v617_v52  ;;  %v478_v0 = vpop.f32.mrf.mxu0  ;;  %v557_v52 = vmul.f32 0.5, %v2710_v38 }
  0xa4   : > { %v669_v59 = vadd.f32 %v639_v54, %v2707_v37  ;;  %v684_v60 = vadd.f32 %v654_v50, %v2699_v31  ;;  %v2733_v63 = vadd.f32 %v2681_v17, %v515_v55  ;;  %v535_v7 = vpop.f32.mrf.mxu3  ;;  %v2745_v10 = vadd.f32 %v2681_v17, %v478_v0  ;;  %v498_v28 = vpop.f32.mrf.mxu1  ;;  %v2832_v50 = vld [vmem:[%s4497_s3 + $0x5] ss:$0 sm:$0xff] }
  0xa5   : > { %v692_v57 = vadd.f32 %v662_v51, %v2702_v32  ;;  %v677_v62 = vadd.f32 %v647_v58, %v2710_v38  ;;  %v2742_v9 = vadd.f32 %v2681_v17, %v535_v7  ;;  %v2819_v32 = vadd.f32 %v2681_v17, %v498_v28  ;;  %v2859_v38 = vld [vmem:[%s4497_s3 + $0x7] ss:$0 sm:$0xff] }
  0xa6   : > { %v2435_v1 = vpop.eup %2434  ;;  %v699_v4 = vmul.f32 0.7978846, %v669_v59  ;;  %v714_v12 = vmul.f32 0.7978846, %v684_v60  ;;  %v595_v13 = vmul.f32 %v2733_v63, %v2733_v63  ;;  %v580_v27 = vmul.f32 %v2745_v10, %v2745_v10 }
  0xa7   : > { %v722_v61 = vmul.f32 0.7978846, %v692_v57  ;;  %v2437_v5 = vpop.eup %2436  ;;  %v707_v6 = vmul.f32 0.7978846, %v677_v62  ;;  %v758_v8 = vadd.f32 1.0, %v2435_v1  ;;  %v603_v24 = vmul.f32 %v2742_v9, %v2742_v9 }
  0xa8   : > { %v766_v11 = vadd.f32 1.0, %v2437_v5  ;;  %v625_v26 = vmul.f32 %v595_v13, %v2733_v63  ;;  %v610_v49 = vmul.f32 %v580_v27, %v2745_v10  ;;  %v2842_v53 = vmul.f32 0.5, %v2733_v63  ;;  %v2870_v62 = vld [vmem:[%s4497_s3 + $0x8] ss:$0 sm:$0xff] }
  0xa9   : > { %2438 = vtanh.f32 %v722_v61  ;;  %v788_v20 = vmul.f32 %v758_v8, %v548_v14  ;;  %v633_v31 = vmul.f32 %v603_v24, %v2742_v9  ;;  %v2845_v54 = vmul.f32 0.5, %v2742_v9 }
  0xaa   : > { %2440 = vtanh.f32 %v699_v4  ;;  %v796_v25 = vmul.f32 %v766_v11, %v556_v19  ;;  %v655_v47 = vmul.f32 0.044715, %v625_v26  ;;  %v2848_v55 = vmul.f32 0.5, %v2745_v10 }
  0xab   : > { %2442 = vtanh.f32 %v707_v6  ;;  %v992_v41 = vsel %vm2778_vm9, %v788_v20, 0.0  ;;  %v2862_v60 = vmul.f32 0.5, %v2819_v32  ;;  %v663_v4 = vmul.f32 0.044715, %v633_v31  ;;  %vm2921_vm9 = vmand %vm2899_vm3, %vm866_vm6 }
  0xac   : > { %2444 = vtanh.f32 %v714_v12  ;;  %v1000_v37 = vsel %vm2794_vm10, %v796_v25, 0.0  ;;  %v2851_v57 = vmul.f32 %v2788_v30, %v992_v41  ;;  %v2854_v58 = vmul.f32 %v2803_v35, %v992_v41 }
  0xad   : > { %v2865_v61 = vmul.f32 %v2788_v30, %v1000_v37  ;;  %v2873_v5 = vmul.f32 %v2803_v35, %v1000_v37  ;;  %v685_v7 = vadd.f32 %v655_v47, %v2733_v63  ;;  %v640_v8 = vmul.f32 0.044715, %v610_v49  ;;  %v2952_v47 = vld [vmem:[%s4497_s3 + $0x3] ss:$0 sm:$0xff] }
  0xae   : > { %v588_v11 = vmul.f32 %v2819_v32, %v2819_v32  ;;  %v2887_v12 = vmul.f32 %v2813_v42, %v992_v41  ;;  %v2890_v13 = vmul.f32 %v2826_v45, %v1000_v37  ;;  %v2893_v14 = vmul.f32 %v2832_v50, %v1000_v37 }
  0xaf   : > { %v2439_v29 = vpop.eup %2438  ;;  %4560 = vst [vmem:[#allocation5_spill] sm:$0xff] %v2865_v61  ;;  %v1107_v19 = vrot.slane %v2851_v57, 1  ;;  %v1230_v20 = vrot.slane %v2854_v58, 2  ;;  %v2906_v24 = vmul.f32 %v2859_v38, %v1000_v37  ;;  %v2912_v26 = vmul.f32 %v2870_v62, %v1000_v37 }
  0xb0   : > { %v2441_v34 = vpop.eup %2440  ;;  %v782_v43 = vadd.f32 1.0, %v2439_v29  ;;  %4561 = vst [vmem:[#allocation6_spill] sm:$0xff] %v2873_v5  ;;  %v715_v33 = vmul.f32 0.7978846, %v685_v7  ;;  %vm1229_vm10 = vcmask 1045504   ;;  %v618_v31 = vmul.f32 %v588_v11, %v2819_v32  ;;  %v518_v29 = vpop.f32.mrf.mxu2 }
  0xb1   : > { %v2443_v44 = vpop.eup %2442  ;;  %v759_v46 = vadd.f32 1.0, %v2441_v34  ;;  %4564 = vst [vmem:[#allocation7_spill] sm:$0xff] %v2890_v13  ;;  %v693_v34 = vadd.f32 %v663_v4, %v2742_v9  ;;  %v4572_v9 = vmov 0 }
  0xb2   : > { %v2445_v56 = vpop.eup %2444  ;;  %v812_v0 = vmul.f32 %v782_v43, %v572_v39  ;;  %v767_v1 = vadd.f32 1.0, %v2443_v44  ;;  %4565 = vst [vmem:[#allocation8_spill] sm:$0xff] %v2893_v14  ;;  %v670_v39 = vadd.f32 %v640_v8, %v2745_v10  ;;  %v4573_v9 = vsel %vm2938_vm11, 4294967295, %v4572_v9  ;;  %v500_v14 = vpop.f32.mrf.mxu1 }
  0xb3   : > { %v789_v59 = vmul.f32 %v759_v46, %v549_v40  ;;  %v774_v16 = vadd.f32 1.0, %v2445_v56  ;;  %4568 = vst [vmem:[#allocation9_spill] sm:$0xff] %v2906_v24  ;;  %v2965_v56 = vld [vmem:[%s4497_s3 + $0x6] ss:$0 sm:$0xff]  ;;  %2446 = vtanh.f32 %v715_v33  ;;  %v648_v7 = vmul.f32 0.044715, %v618_v31  ;;  %v480_v24 = vpop.f32.mrf.mxu0 }
  0xb4   : > { %4569 = vst [vmem:[#allocation10_spill] sm:$0xff] %v2912_v26  ;;  %v1016_v18 = vsel %vm2879_vm2, %v812_v0, 0.0  ;;  %v797_v27 = vmul.f32 %v767_v1, %v557_v52  ;;  %v700_v0 = vmul.f32 0.7978846, %v670_v39  ;;  %v3009_v40 = vadd.f32 %v2681_v17, %v518_v29 }
  0xb5   : > { %v993_v21 = vsel %vm2752_vm5, %v789_v59, 0.0  ;;  %v804_v41 = vmul.f32 %v774_v16, %v564_v36  ;;  %4574 = vst [vmem:[#allocation11_spill] sm:$0xff] %v4573_v9  ;;  %v2943_v10 = vmul.f32 %v2826_v45, %v1016_v18  ;;  %v2946_v36 = vmul.f32 %v2832_v50, %v1016_v18 }
  0xb6   : > { %v2929_v43 = vmul.f32 %v2788_v30, %v993_v21  ;;  %v2955_v49 = vmul.f32 %v2859_v38, %v1016_v18  ;;  %v2958_v23 = vmul.f32 %v2870_v62, %v1016_v18  ;;  %v1001_v52 = vsel %vm2921_vm9, %v797_v27, 0.0 }
  0xb7   : > { %v2968_v57 = vmul.f32 %v2803_v35, %v993_v21  ;;  %v723_v59 = vmul.f32 0.7978846, %v693_v34  ;;  %v2972_v1 = vsel %vm2938_vm11, %v804_v41, 0.0  ;;  %v2975_v4 = vmul.f32 %v2952_v47, %v1016_v18 }
  0xb8   : > { %4575 = vst [vmem:[#allocation12_spill] sm:$0xff] %v2972_v1  ;;  %v4502_v6 = vrot.slane %v2929_v43, 1  ;;  %v2981_v16 = vmul.f32 %v2965_v56, %v1016_v18  ;;  %v2984_v27 = vmul.f32 %v2788_v30, %v1001_v52  ;;  %v2989_v39 = vmul.f32 %v2813_v42, %v993_v21  ;;  %v520_v13 = vpop.f32.mrf.mxu2 }
  0xb9   : > { %4576 = vst [vmem:[#allocation13_spill] sm:$0xff] %v2975_v4  ;;  %v2992_v41 = vmul.f32 %v2803_v35, %v1001_v52  ;;  %v4501_v31 = vrot.slane %v2968_v57, 2  ;;  %v2996_v46 = vmul.f32 %v2813_v42, %v1001_v52  ;;  %v2999_v18 = vmul.f32 %v2826_v45, %v1001_v52  ;;  %v2447_v28 = vpop.eup %2446 }
  0xba   : > { %4577 = vst [vmem:[#allocation14_spill] sm:$0xff] %v2981_v16  ;;  %2448 = vtanh.f32 %v700_v0  ;;  %v1109_v37 = vsel %vm1106_vm4, %v1107_v19, %v4502_v6  ;;  %v3005_v44 = vmul.f32 %v2952_v47, %v1001_v52  ;;  %v678_v21 = vadd.f32 %v648_v7, %v2819_v32 }
  0xbb   : > { %4578 = vst [vmem:[#allocation15_spill] sm:$0xff] %v2999_v18  ;;  %v3013_v34 = vmul.f32 %v2832_v50, %v1001_v52  ;;  %v3016_v0 = vmul.f32 %v2965_v56, %v1001_v52  ;;  %2450 = vtanh.f32 %v723_v59  ;;  %v3020_v33 = vmul.f32 %v2859_v38, %v1001_v52 }
  0xbc   : > { %4579 = vst [vmem:[#allocation16_spill] sm:$0xff] %v3005_v44  ;;  %v775_v11 = vadd.f32 1.0, %v2447_v28  ;;  %v708_v32 = vmul.f32 0.7978846, %v678_v21  ;;  %v1163_v7 = vadd.f32 %v1109_v37, %v2887_v12  ;;  %v1232_v29 = vsel %vm1229_vm10, %v1230_v20, %v4501_v31  ;;  %v538_v37 = vpop.f32.mrf.mxu3 }
  0xbd   : > { %4580 = vst [vmem:[#allocation17_spill] sm:$0xff] %v3013_v34  ;;  %v3030_v8 = vmul.f32 %v2870_v62, %v1001_v52  ;;  %v3039_v12 = vmul.f32 %v2788_v30, %v2972_v1  ;;  %v3043_v58 = vmul.f32 %v2803_v35, %v2972_v1  ;;  %v596_v20 = vmul.f32 %v3009_v40, %v3009_v40 }
  0xbe   : > { %4581 = vst [vmem:[#allocation18_spill] sm:$0xff] %v3016_v0  ;;  %v805_v28 = vmul.f32 %v775_v11, %v2842_v53  ;;  %v3050_v21 = vmul.f32 %v2826_v45, %v2972_v1  ;;  %v3054_v53 = vmul.f32 %v2832_v50, %v2972_v1  ;;  %v3058_v11 = vmul.f32 %v2859_v38, %v2972_v1 }
  0xbf   : > { %4582 = vst [vmem:[#allocation19_spill] sm:$0xff] %v3020_v33  ;;  %v3063_v31 = vmul.f32 %v2870_v62, %v2972_v1  ;;  %2452 = vtanh.f32 %v708_v32  ;;  %v3065_v6 = vadd.f32 %v1232_v29, %v1163_v7  ;;  %v1035_v4 = vmul.f32 %v2813_v42, %v2972_v1 }
  0xc0   : > { %4583 = vst [vmem:[#allocation20_spill] sm:$0xff] %v3030_v8  ;;  %v2449_v52 = vpop.eup %2448  ;;  %v1009_v19 = vsel %vm919_vm12, %v805_v28, 0.0  ;;  %v539_v26 = vadd.f32 %v2681_v17, %v538_v37  ;;  %v626_v44 = vmul.f32 %v596_v20, %v3009_v40  ;;  %v481_v28 = vadd.f32 %v2681_v17, %v480_v24  ;;  %vm928_vm12 = vmand %vm2836_vm1, %vm901_vm8 }
  0xc1   : > { %4584 = vst [vmem:[#allocation21_spill] sm:$0xff] %v3039_v12  ;;  %v2451_v59 = vpop.eup %2450  ;;  %v760_v25 = vadd.f32 1.0, %v2449_v52  ;;  %v1075_v32 = vmul.f32 %v2788_v30, %v1009_v19  ;;  %v1198_v37 = vmul.f32 %v2803_v35, %v1009_v19  ;;  %v1352_v52 = vmul.f32 %v2826_v45, %v1009_v19 }
  0xc2   : > { %4585 = vst [vmem:[#allocation22_spill] sm:$0xff] %v3043_v58  ;;  %v783_v0 = vadd.f32 1.0, %v2451_v59  ;;  %v3083_v20 = vadd.s32 6, %v2723_v48  ;;  %v604_v5 = vmul.f32 %v539_v26, %v539_v26  ;;  %v3086_v7 = vadd.f32 %v2681_v17, %v500_v14 }
  0xc3   : > { %4586 = vst [vmem:[#allocation23_spill] sm:$0xff] %v3050_v21  ;;  %v1474_v16 = vmul.f32 %v2832_v50, %v1009_v19  ;;  %v790_v61 = vmul.f32 %v760_v25, %v2848_v55  ;;  %v656_v22 = vmul.f32 0.044715, %v626_v44  ;;  %v3091_v9 = vadd.f32 %v2681_v17, %v520_v13 }
  0xc4   : > { %4587 = vst [vmem:[#allocation24_spill] sm:$0xff] %v3054_v53  ;;  %v1135_v59 = vrot.slane %v1075_v32, 1  ;;  %v1627_v24 = vmul.f32 %v2859_v38, %v1009_v19  ;;  %v3099_v14 = vmul.f32 0.5, %v3009_v40  ;;  %v3101_v1 = vmul.f32 0.5, %v539_v26 }
  0xc5   : > { %4588 = vst [vmem:[#allocation25_spill] sm:$0xff] %v3058_v11  ;;  %v2453_v29 = vpop.eup %2452  ;;  %v1749_v55 = vmul.f32 %v2870_v62, %v1009_v19  ;;  %v813_v25 = vmul.f32 %v783_v0, %v2845_v54  ;;  %v3105_v13 = vmul.f32 0.5, %v481_v28  ;;  %v1409_v44 = vrot.slane %v1352_v52, 1 }
  0xc6   : > { %4589 = vst [vmem:[#allocation26_spill] sm:$0xff] %v3063_v31  ;;  %v768_v32 = vadd.f32 1.0, %v2453_v29  ;;  %v634_v8 = vmul.f32 %v604_v5, %v539_v26  ;;  %v581_v33 = vmul.f32 %v481_v28, %v481_v28  ;;  %v1531_v3 = vrot.slane %v1474_v16, 2 }
  0xc7   : > { %4590 = vst [vmem:[#allocation27_spill] sm:$0xff] %v3065_v6  ;;  %v1258_v6 = vrot.slane %v1198_v37, 2  ;;  %v994_v34 = vsel %vm904_vm13, %v790_v61, 0.0  ;;  %v686_v15 = vadd.f32 %v656_v22, %v3009_v40  ;;  %v3109_v18 = vadd.s32 1, %v2723_v48 }
  0xc8   : > { %4591 = vst [vmem:[#allocation28_spill] sm:$0xff] %v3101_v1  ;;  %v4592_v1 = vrot.slane %v3039_v12, 1  ;;  %v1682_v19 = vrot.slane %v1627_v24, 1  ;;  %v798_v54 = vmul.f32 %v768_v32, %v2862_v60  ;;  %v3116_v0 = vmul.f32 0.5, %v3086_v7 }
  0xc9   : > { %v4593_v5 = vrot.slane %v3043_v58, 2  ;;  %v1804_v61 = vrot.slane %v1749_v55, 2  ;;  %v1017_v22 = vsel %vm2836_vm1, %v813_v25, 0.0  ;;  %v716_v40 = vmul.f32 0.7978846, %v686_v15 }
  0xca   : > { %v1136_v37 = vsel %vm1106_vm4, %v4592_v1, %v1135_v59  ;;  %v4594_v29 = vrot.slane %v3050_v21, 1  ;;  %v1060_v1 = vmul.f32 %v2788_v30, %v994_v34  ;;  %vm842_vm5 = vcmp.ge.s32.totalorder %v3083_v20, 0 }
  0xcb   : > { %v1259_v16 = vsel %vm1229_vm10, %v4593_v5, %v1258_v6  ;;  %vm852_vm14 = vcmp.lt.s32.totalorder %v3083_v20, 16  ;;  %v664_v60 = vmul.f32 0.044715, %v634_v8  ;;  %v611_v59 = vmul.f32 %v581_v33, %v481_v28 }
  0xcc   : > { %v3126_v52 = vsel %vm1106_vm4, %v4594_v29, %v1409_v44  ;;  %v1174_v24 = vadd.f32 %v1136_v37, %v1035_v4  ;;  %v4596_v6 = vrot.slane %v3054_v53, 2  ;;  %v3138_v25 = vsel %vm2899_vm3, %v798_v54, 0.0  ;;  %vm3233_vm15 = vmand %vm842_vm5, %vm852_vm14 }
  0xcd   : > { %4595 = vst [vmem:[#allocation29_spill] sm:$0xff] %v3126_v52  ;;  %2454 = vtanh.f32 %v716_v40  ;;  %v3141_v44 = vmul.f32 %v2826_v45, %v1017_v22  ;;  %v3144_v32 = vmul.f32 %v2832_v50, %v1017_v22  ;;  %v694_v15 = vadd.f32 %v664_v60, %v539_v26  ;;  %vm887_vm0 = vmand %vm3233_vm15, %vm866_vm6 }
  0xce   : > { %v3134_v55 = vsel %vm1229_vm10, %v4596_v6, %v1531_v3  ;;  %v641_v8 = vmul.f32 0.044715, %v611_v59  ;;  %v3147_v4 = vmul.f32 %v2859_v38, %v1017_v22  ;;  %v3150_v33 = vmul.f32 %v2870_v62, %v1017_v22  ;;  %vm913_vm5 = vmand %vm2899_vm3, %vm901_vm8 }
  0xcf   : > { %4597 = vst [vmem:[#allocation30_spill] sm:$0xff] %v3134_v55  ;;  %v1183_v3 = vmul.f32 %v2803_v35, %v994_v34  ;;  %v589_v37 = vmul.f32 %v3086_v7, %v3086_v7  ;;  %v1110_v54 = vrot.slane %v1060_v1, 1  ;;  %v724_v5 = vmul.f32 0.7978846, %v694_v15 }
  0xd0   : > { %v671_v40 = vadd.f32 %v641_v8, %v481_v28  ;;  %v3157_v29 = vmul.f32 %v2788_v30, %v3138_v25  ;;  %v4598_v26 = vrot.slane %v3058_v11, 1  ;;  %v4600_v59 = vrot.slane %v3063_v31, 2 }
  0xd1   : > { %v3170_v34 = vmul.f32 %v2952_v47, %v1017_v22  ;;  %v619_v1 = vmul.f32 %v589_v37, %v3086_v7  ;;  %v3176_v8 = vmul.f32 %v2965_v56, %v1017_v22  ;;  %2456 = vtanh.f32 %v724_v5 }
  0xd2   : > { %v3162_v60 = vsel %vm1106_vm4, %v4598_v26, %v1682_v19  ;;  %v3167_v6 = vsel %vm1229_vm10, %v4600_v59, %v1804_v61  ;;  %v4524_v26 = vrot.slane %v3147_v4, 1  ;;  %v4523_v31 = vrot.slane %v3150_v33, 2 }
  0xd3   : > { %4599 = vst [vmem:[#allocation31_spill] sm:$0xff] %v3162_v60  ;;  %v2455_v19 = vpop.eup %2454  ;;  %v701_v61 = vmul.f32 0.7978846, %v671_v40  ;;  %v649_v59 = vmul.f32 0.044715, %v619_v1  ;;  %v3180_v11 = vadd.f32 %v1259_v16, %v1174_v24  ;;  %v1233_v28 = vrot.slane %v1183_v3, 2 }
  0xd4   : > { %4601 = vst [vmem:[#allocation32_spill] sm:$0xff] %v3167_v6  ;;  %v4525_v15 = vrot.slane %v3157_v29, 1  ;;  %v776_v53 = vadd.f32 1.0, %v2455_v19  ;;  %v3189_v5 = vmul.f32 %v2803_v35, %v3138_v25  ;;  %v3193_v40 = vmul.f32 %v2826_v45, %v3138_v25  ;;  %v4643_v6 = vld [vmem:[#allocation20_spill] sm:$0xff] }
  0xd5   : > { %4602 = vst [vmem:[#allocation33_spill] sm:$0xff] %v3170_v34  ;;  %v4604_v34 = vrot.slane %v2929_v43, 1  ;;  %v679_v22 = vadd.f32 %v649_v59, %v3086_v7  ;;  %v4605_v16 = vrot.slane %v3141_v44, 1  ;;  %v4606_v43 = vrot.slane %v2943_v10, 1 }
  0xd6   : > { %4603 = vst [vmem:[#allocation34_spill] sm:$0xff] %v3176_v8  ;;  %v4608_v3 = vrot.slane %v3144_v32, 2  ;;  %v597_v1 = vmul.f32 %v3091_v9, %v3091_v9  ;;  %v4611_v10 = vrot.slane %v2955_v49, 1  ;;  %2458 = vtanh.f32 %v701_v61  ;;  %v4627_v8 = vld [vmem:[#allocation17_spill] sm:$0xff] }
  0xd7   : > { %v1111_v37 = vsel %vm1106_vm4, %v4604_v34, %v1110_v54  ;;  %v3200_v24 = vsel %vm1106_vm4, %v4606_v43, %v4605_v16  ;;  %v4609_v54 = vrot.slane %v2946_v36, 2  ;;  %v3211_v34 = vmul.f32 %v2832_v50, %v3138_v25  ;;  %v2457_v43 = vpop.eup %2456 }
  0xd8   : > { %4607 = vst [vmem:[#allocation35_spill] sm:$0xff] %v3200_v24  ;;  %v3220_v19 = vsel %vm1106_vm4, %v4611_v10, %v4524_v26  ;;  %v4613_v36 = vrot.slane %v2958_v23, 2  ;;  %v3239_v49 = vmul.f32 %v2859_v38, %v3138_v25  ;;  %v4617_v23 = vrot.slane %v2968_v57, 2  ;;  %v540_v57 = vpop.f32.mrf.mxu3 }
  0xd9   : > { %v3207_v7 = vsel %vm1229_vm10, %v4609_v54, %v4608_v3  ;;  %4612 = vst [vmem:[#allocation37_spill] sm:$0xff] %v3220_v19  ;;  %v1164_v3 = vadd.f32 %v1111_v37, %v2989_v39  ;;  %v3247_v10 = vmul.f32 %v2952_v47, %v3138_v25  ;;  %v4619_v20 = vrot.slane %v2984_v27, 1 }
  0xda   : > { %4610 = vst [vmem:[#allocation36_spill] sm:$0xff] %v3207_v7  ;;  %v3227_v59 = vsel %vm1229_vm10, %v4613_v36, %v4523_v31  ;;  %v1234_v54 = vsel %vm1229_vm10, %v4617_v23, %v1233_v28  ;;  %v806_v36 = vmul.f32 %v776_v53, %v3099_v14  ;;  %v709_v31 = vmul.f32 0.7978846, %v679_v22 }
  0xdb   : > { %4614 = vst [vmem:[#allocation38_spill] sm:$0xff] %v3227_v59  ;;  %v1124_v61 = vsel %vm1106_vm4, %v4619_v20, %v4525_v15  ;;  %v4527_v26 = vrot.slane %v3189_v5, 2  ;;  %v4526_v39 = vrot.slane %v3193_v40, 1  ;;  %v3259_v28 = vmul.f32 %v2965_v56, %v3138_v25  ;;  %v4625_v59 = vld [vmem:[#allocation28_spill] sm:$0xff] }
  0xdc   : > { %4618 = vst [vmem:[#allocation39_spill] sm:$0xff] %v3247_v10  ;;  %v627_v37 = vmul.f32 %v597_v1, %v3091_v9  ;;  %v3268_v53 = vadd.f32 %v2681_v17, %v540_v57  ;;  %v784_v14 = vadd.f32 1.0, %v2457_v43  ;;  %vm837_vm2 = vcmp.ge.s32.totalorder %v3109_v18, 0  ;;  %v483_v57 = vpop.f32.mrf.mxu0  ;;  %v2459_v43 = vpop.eup %2458 }
  0xdd   : > { %4620 = vst [vmem:[#allocation40_spill] sm:$0xff] %v3259_v28  ;;  %v1169_v22 = vadd.f32 %v1124_v61, %v2996_v46  ;;  %v3273_v20 = vadd.f32 %v1234_v54, %v1164_v3  ;;  %vm847_vm9 = vcmp.lt.s32.totalorder %v3109_v18, 16  ;;  %v3278_v15 = vmul.f32 %v2813_v42, %v3138_v25  ;;  %v4622_v54 = vld [vmem:[#allocation15_spill] sm:$0xff] }
  0xde   : > { %v3282_v1 = vmul.f32 %v2870_v62, %v3138_v25  ;;  %v1010_v27 = vsel %vm887_vm0, %v806_v36, 0.0  ;;  %2460 = vtanh.f32 %v709_v31  ;;  %v4621_v46 = vrot.slane %v2992_v41, 2  ;;  %vm3346_vm1 = vmand %vm837_vm2, %vm847_vm9 }
  0xdf   : > { %v4623_v61 = vrot.slane %v4622_v54, 1  ;;  %v814_v25 = vmul.f32 %v784_v14, %v4625_v59  ;;  %v4626_v19 = vrot.slane %v3211_v34, 2  ;;  %v4628_v36 = vrot.slane %v4627_v8, 2  ;;  %v4633_v14 = vld [vmem:[#allocation19_spill] sm:$0xff]  ;;  %vm872_vm13 = vmand %vm3346_vm1, %vm866_vm6 }
  0xe0   : > { %v1247_v3 = vsel %vm1229_vm10, %v4621_v46, %v4527_v26  ;;  %v657_v7 = vmul.f32 0.044715, %v627_v37  ;;  %v605_v41 = vmul.f32 %v3268_v53, %v3268_v53  ;;  %v4632_v59 = vrot.slane %v3239_v49, 1 }
  0xe1   : > { %v3294_v23 = vsel %vm1106_vm4, %v4623_v61, %v4526_v39  ;;  %v3302_v31 = vsel %vm1229_vm10, %v4628_v36, %v4626_v19  ;;  %v3310_v54 = vadd.f32 %v1247_v3, %v1169_v22  ;;  %v4634_v61 = vrot.slane %v4633_v14, 1  ;;  %v503_v36 = vpop.f32.mrf.mxu1 }
  0xe2   : > { %4624 = vst [vmem:[#allocation15_spill] sm:$0xff] %v3294_v23  ;;  %v3320_v19 = vmul.f32 0.5, %v3091_v9  ;;  %v484_v37 = vadd.f32 %v2681_v17, %v483_v57  ;;  %v3324_v39 = vmul.f32 %v2788_v30, %v1010_v27  ;;  %v3327_v51 = vmul.f32 %v2803_v35, %v1010_v27 }
  0xe3   : > { %4629 = vst [vmem:[#allocation28_spill] sm:$0xff] %v3302_v31  ;;  %v3317_v8 = vsel %vm1106_vm4, %v4634_v61, %v4632_v59  ;;  %v761_v22 = vadd.f32 1.0, %v2459_v43  ;;  %v3331_v14 = vmul.f32 %v2826_v45, %v1010_v27  ;;  %v3334_v59 = vmul.f32 %v2832_v50, %v1010_v27 }
  0xe4   : > { %4631 = vst [vmem:[#allocation17_spill] sm:$0xff] %v3310_v54  ;;  %v3337_v61 = vmul.f32 %v2859_v38, %v1010_v27  ;;  %v3340_v57 = vadd.s32 9, %v2723_v48  ;;  %v1018_v26 = vsel %vm928_vm12, %v814_v25, 0.0  ;;  %v687_v3 = vadd.f32 %v657_v7, %v3091_v9  ;;  %v2461_v58 = vpop.eup %2460 }
  0xe5   : > { %4635 = vst [vmem:[#allocation3_spill] sm:$0xff] %v3317_v8  ;;  %v635_v24 = vmul.f32 %v605_v41, %v3268_v53  ;;  %v3353_v21 = vadd.f32 %v2681_v17, %v503_v36  ;;  %v3356_v12 = vmul.f32 %v2813_v42, %v1010_v27  ;;  %v3359_v25 = vmul.f32 %v2952_v47, %v1010_v27 }
  0xe6   : > { %4636 = vst [vmem:[#allocation19_spill] sm:$0xff] %v3337_v61  ;;  %v3362_v18 = vmul.f32 %v2965_v56, %v1010_v27  ;;  %v582_v31 = vmul.f32 %v484_v37, %v484_v37  ;;  %v3367_v7 = vmul.f32 %v2870_v62, %v1010_v27  ;;  %v791_v41 = vmul.f32 %v761_v22, %v3105_v13 }
  0xe7   : > { %4639 = vst [vmem:[#allocation41_spill] sm:$0xff] %v3359_v25  ;;  %v1361_v25 = vmul.f32 %v2826_v45, %v1018_v26  ;;  %v1483_v9 = vmul.f32 %v2832_v50, %v1018_v26  ;;  %v769_v8 = vadd.f32 1.0, %v2461_v58  ;;  %v717_v27 = vmul.f32 0.7978846, %v687_v3 }
  0xe8   : > { %4640 = vst [vmem:[#allocation42_spill] sm:$0xff] %v3362_v18  ;;  %v665_v18 = vmul.f32 0.044715, %v635_v24  ;;  %v1636_v13 = vmul.f32 %v2859_v38, %v1018_v26  ;;  %v1758_v22 = vmul.f32 %v2870_v62, %v1018_v26  ;;  %v612_v23 = vmul.f32 %v582_v31, %v484_v37 }
  0xe9   : > { %4641 = vst [vmem:[#allocation43_spill] sm:$0xff] %v3367_v7  ;;  %v590_v28 = vmul.f32 %v3353_v21, %v3353_v21  ;;  %v995_v36 = vsel %vm872_vm13, %v791_v41, 0.0  ;;  %v799_v10 = vmul.f32 %v769_v8, %v3116_v0  ;;  %2462 = vtanh.f32 %v717_v27  ;;  %v523_v27 = vpop.f32.mrf.mxu2 }
  0xea   : > { %v695_v58 = vadd.f32 %v665_v18, %v3268_v53  ;;  %v1424_v3 = vrot.slane %v1361_v25, 1  ;;  %v4642_v26 = vrot.slane %v3282_v1, 2  ;;  %v4644_v55 = vrot.slane %v4643_v6, 2 }
  0xeb   : > { %v642_v31 = vmul.f32 0.044715, %v612_v23  ;;  %v1546_v60 = vrot.slane %v1483_v9, 2  ;;  %v1003_v52 = vsel %vm913_vm5, %v799_v10, 0.0  ;;  %v620_v41 = vmul.f32 %v590_v28, %v3353_v21 }
  0xec   : > { %v3395_v63 = vsel %vm1229_vm10, %v4644_v55, %v4642_v26  ;;  %v725_v61 = vmul.f32 0.7978846, %v695_v58  ;;  %v1697_v0 = vrot.slane %v1636_v13, 1  ;;  %v1819_v8 = vrot.slane %v1758_v22, 2 }
  0xed   : > { %4645 = vst [vmem:[#allocation20_spill] sm:$0xff] %v3395_v63  ;;  %v3399_v18 = vmul.f32 %v2788_v30, %v995_v36  ;;  %v3402_v25 = vmul.f32 0.5, %v3268_v53  ;;  %v1069_v6 = vmul.f32 %v2788_v30, %v1003_v52  ;;  %vm845_vm3 = vcmp.ge.s32.totalorder %v3340_v57, 0  ;;  %v543_v63 = vpop.f32.mrf.mxu3 }
  0xee   : > { %2464 = vtanh.f32 %v725_v61  ;;  %vm855_vm14 = vcmp.lt.s32.totalorder %v3340_v57, 16  ;;  %v552_v55 = vmul.f32 0.5, %v484_v37  ;;  %v672_v10 = vadd.f32 %v642_v31, %v484_v37 }
  0xef   : > { %v4646_v28 = vrot.slane %v3141_v44, 1  ;;  %v3413_v9 = vmul.f32 %v2813_v42, %v995_v36  ;;  %v3416_v53 = vmul.f32 %v2803_v35, %v995_v36  ;;  %v1304_v13 = vmul.f32 %v2952_v47, %v995_v36  ;;  %v2463_v61 = vpop.eup %2462  ;;  %vm3469_vm0 = vmand %vm845_vm3, %vm855_vm14 }
  0xf0   : > { %v4648_v22 = vrot.slane %v3144_v32, 2  ;;  %v702_v37 = vmul.f32 0.7978846, %v672_v10  ;;  %v650_v26 = vmul.f32 0.044715, %v620_v41  ;;  %v524_v44 = vadd.f32 %v2681_v17, %v523_v27  ;;  %vm896_vm2 = vmand %vm3469_vm0, %vm866_vm6 }
  0xf1   : > { %v3410_v23 = vsel %vm1106_vm4, %v4646_v28, %v1424_v3  ;;  %v4650_v3 = vrot.slane %v3147_v4, 1  ;;  %v4652_v28 = vrot.slane %v3150_v33, 2  ;;  %v3437_v32 = vmul.f32 %v2826_v45, %v995_v36  ;;  %vm922_vm3 = vmand %vm3233_vm15, %vm901_vm8 }
  0xf2   : > { %4647 = vst [vmem:[#allocation44_spill] sm:$0xff] %v3410_v23  ;;  %v3422_v58 = vsel %vm1229_vm10, %v4648_v22, %v1546_v60  ;;  %v1125_v60 = vrot.slane %v1069_v6, 1  ;;  %v1192_v41 = vmul.f32 %v2803_v35, %v1003_v52  ;;  %v1346_v27 = vmul.f32 %v2826_v45, %v1003_v52  ;;  %v4654_v22 = vld [vmem:[#allocation27_spill] sm:$0xff] }
  0xf3   : > { %4649 = vst [vmem:[#allocation45_spill] sm:$0xff] %v3422_v58  ;;  %v3428_v31 = vsel %vm1106_vm4, %v4650_v3, %v1697_v0  ;;  %v3433_v24 = vsel %vm1229_vm10, %v4652_v28, %v1819_v8  ;;  %v777_v10 = vadd.f32 1.0, %v2463_v61  ;;  %v1468_v0 = vmul.f32 %v2832_v50, %v1003_v52 }
  0xf4   : > { %4651 = vst [vmem:[#allocation46_spill] sm:$0xff] %v3428_v31  ;;  %2466 = vtanh.f32 %v702_v37  ;;  %v680_v33 = vadd.f32 %v650_v26, %v3353_v21  ;;  %v2465_v8 = vpop.eup %2464  ;;  %v3445_v3 = vadd.f32 %v1304_v13, %v4654_v22  ;;  %v1621_v28 = vmul.f32 %v2859_v38, %v1003_v52 }
  0xf5   : > { %4653 = vst [vmem:[#allocation47_spill] sm:$0xff] %v3433_v24  ;;  %v807_v6 = vmul.f32 %v777_v10, %v3320_v19  ;;  %v598_v23 = vmul.f32 %v524_v44, %v524_v44  ;;  %v3451_v61 = vmul.f32 %v2832_v50, %v995_v36  ;;  %v1743_v4 = vmul.f32 %v2870_v62, %v1003_v52  ;;  %v485_v10 = vpop.f32.mrf.mxu0 }
  0xf6   : > { %v710_v31 = vmul.f32 0.7978846, %v680_v33  ;;  %v4655_v37 = vrot.slane %v3157_v29, 1  ;;  %v1248_v58 = vrot.slane %v1192_v41, 2  ;;  %v1399_v13 = vrot.slane %v1346_v27, 1 }
  0xf7   : > { %v628_v22 = vmul.f32 %v598_v23, %v524_v44  ;;  %v1521_v7 = vrot.slane %v1468_v0, 2  ;;  %v785_v54 = vadd.f32 1.0, %v2465_v8  ;;  %v560_v19 = vmul.f32 0.5, %v3353_v21 }
  0xf8   : > { %v1126_v26 = vsel %vm1106_vm4, %v4655_v37, %v1125_v60  ;;  %2468 = vtanh.f32 %v710_v31  ;;  %v1672_v24 = vrot.slane %v1621_v28, 1  ;;  %v3460_v36 = vsel %vm3233_vm15, %v807_v6, 0.0  ;;  %vm907_vm15 = vmand %vm3346_vm1, %vm901_vm8 }
  0xf9   : > { %v823_v52 = vadd.s32 4, %v2723_v48  ;;  %v658_v29 = vmul.f32 0.044715, %v628_v22  ;;  %v1170_v23 = vadd.f32 %v1126_v26, %v3278_v15  ;;  %v1794_v41 = vrot.slane %v1743_v4, 2 }
  0xfa   : > { %v2467_v33 = vpop.eup %2466  ;;  %v3474_v31 = vadd.f32 %v2681_v17, %v543_v63  ;;  %v4658_v27 = vrot.slane %v3189_v5, 2  ;;  %v4659_v8 = vrot.slane %v3193_v40, 1  ;;  %v3485_v28 = vadd.f32 %v2681_v17, %v485_v10 }
  0xfb   : > { %v762_v4 = vadd.f32 1.0, %v2467_v33  ;;  %v4661_v57 = vrot.slane %v3211_v34, 2  ;;  %v815_v63 = vmul.f32 %v785_v54, %v3402_v25  ;;  %v688_v37 = vadd.f32 %v658_v29, %v524_v44 }
  0xfc   : > { %v1249_v0 = vsel %vm1229_vm10, %v4658_v27, %v1248_v58  ;;  %v3482_v15 = vsel %vm1106_vm4, %v4659_v8, %v1399_v13  ;;  %v3495_v5 = vmul.f32 %v2788_v30, %v3460_v36  ;;  %v4663_v40 = vrot.slane %v3239_v49, 1 }
  0xfd   : > { %4660 = vst [vmem:[#allocation27_spill] sm:$0xff] %v3482_v15  ;;  %v3490_v6 = vsel %vm1229_vm10, %v4661_v57, %v1521_v7  ;;  %v792_v17 = vmul.f32 %v762_v4, %v552_v55  ;;  %vm840_vm9 = vcmp.ge.s32.totalorder %v823_v52, 0  ;;  %vm850_vm12 = vcmp.lt.s32.totalorder %v823_v52, 16 }
  0xfe   : > { %4662 = vst [vmem:[#allocation48_spill] sm:$0xff] %v3490_v6  ;;  %v3500_v58 = vsel %vm1106_vm4, %v4663_v40, %v1672_v24  ;;  %v2469_v34 = vpop.eup %2468  ;;  %v3506_v54 = vadd.f32 %v1249_v0, %v1170_v23  ;;  %v4666_v7 = vrot.slane %v3282_v1, 2  ;;  %v3513_v49 = vmul.f32 0.5, %v524_v44  ;;  %vm3522_vm13 = vmand %vm840_vm9, %vm850_vm12 }
  0xff   : > { %4664 = vst [vmem:[#allocation49_spill] sm:$0xff] %v3500_v58  ;;  %v718_v24 = vmul.f32 0.7978846, %v688_v37  ;;  %v996_v26 = vsel %vm3346_vm1, %v792_v17, 0.0  ;;  %v770_v13 = vadd.f32 1.0, %v2469_v34  ;;  %v3518_v22 = vmul.f32 0.5, %v3474_v31  ;;  %vm881_vm5 = vmand %vm3522_vm13, %vm866_vm6 }
 0x100   : > { %4665 = vst [vmem:[#allocation50_spill] sm:$0xff] %v3506_v54  ;;  %v3511_v25 = vsel %vm1229_vm10, %v4666_v7, %v1794_v41  ;;  %v606_v55 = vmul.f32 %v3474_v31, %v3474_v31  ;;  %v1019_v10 = vsel %vm896_vm2, %v815_v63, 0.0  ;;  %v4533_v1 = vrot.slane %v3495_v5, 1  ;;  %vm875_vm12 = vmand %vm2764_vm7, %vm866_vm6 }
 0x101   : > { %4667 = vst [vmem:[#allocation51_spill] sm:$0xff] %v3511_v25  ;;  %v3529_v44 = vmul.f32 %v2803_v35, %v3460_v36  ;;  %v3533_v29 = vmul.f32 %v2826_v45, %v3460_v36  ;;  %v3536_v33 = vmul.f32 %v2788_v30, %v996_v26  ;;  %2470 = vtanh.f32 %v718_v24 }
 0x102   : > { %v3539_v23 = vmul.f32 0.5, %v3485_v28  ;;  %v583_v41 = vmul.f32 %v3485_v28, %v3485_v28  ;;  %v3545_v27 = vmul.f32 %v2965_v56, %v3460_v36  ;;  %v3548_v0 = vmul.f32 %v2826_v45, %v996_v26 }
 0x103   : > { %v800_v8 = vmul.f32 %v770_v13, %v560_v19  ;;  %v1315_v4 = vmul.f32 %v2952_v47, %v3460_v36  ;;  %v3553_v57 = vmul.f32 %v2859_v38, %v1019_v10  ;;  %v3556_v63 = vmul.f32 %v2803_v35, %v996_v26 }
 0x104   : > { %4670 = vst [vmem:[#allocation52_spill] sm:$0xff] %v3545_v27  ;;  %v3564_v37 = vmul.f32 %v2813_v42, %v3460_v36  ;;  %v3568_v19 = vmul.f32 %v2832_v50, %v3460_v36  ;;  %v3571_v40 = vmul.f32 %v2870_v62, %v1019_v10  ;;  %v4671_v17 = vrot.slane %v3324_v39, 1 }
 0x105   : > { %v1305_v60 = vmul.f32 %v2952_v47, %v996_v26  ;;  %v3583_v25 = vmul.f32 %v2832_v50, %v996_v26  ;;  %v3587_v58 = vmul.f32 %v2859_v38, %v3460_v36  ;;  %v3590_v6 = vmul.f32 %v2965_v56, %v1019_v10 }
 0x106   : > { %v1139_v34 = vsel %vm1106_vm4, %v4671_v17, %v4533_v1  ;;  %v1004_v17 = vsel %vm881_vm5, %v800_v8, 0.0  ;;  %v3594_v1 = vadd.f32 %v1315_v4, %v3180_v11  ;;  %v3602_v10 = vmul.f32 %v2813_v42, %v996_v26  ;;  %vm916_vm5 = vmand %vm3522_vm13, %vm901_vm8 }
 0x107   : > { %4672 = vst [vmem:[#allocation53_spill] sm:$0xff] %v3590_v6  ;;  %v2471_v24 = vpop.eup %2470  ;;  %v1175_v15 = vadd.f32 %v1139_v34, %v3356_v12  ;;  %v4673_v39 = vrot.slane %v3529_v44, 2  ;;  %v4674_v8 = vrot.slane %v3327_v51, 2  ;;  %v4675_v4 = vrot.slane %v3533_v29, 1 }
 0x108   : > { %v4676_v13 = vrot.slane %v3331_v14, 1  ;;  %v4678_v12 = vrot.slane %v3536_v33, 1  ;;  %v4679_v34 = vrot.slane %v3399_v18, 1  ;;  %v3622_v54 = vadd.f32 %v1305_v60, %v3273_v20 }
 0x109   : > { %v1262_v11 = vsel %vm1229_vm10, %v4674_v8, %v4673_v39  ;;  %v3626_v39 = vmul.f32 %v2788_v30, %v1004_v17  ;;  %v505_v8 = vpop.f32.mrf.mxu1  ;;  %v4680_v14 = vrot.slane %v3548_v0, 1  ;;  %v778_v27 = vadd.f32 1.0, %v2471_v24 }
 0x10a   : > { %v3614_v7 = vsel %vm1106_vm4, %v4676_v13, %v4675_v4  ;;  %v1114_v26 = vsel %vm1106_vm4, %v4679_v34, %v4678_v12  ;;  %v4681_v13 = vrot.slane %v3437_v32, 1  ;;  %v636_v18 = vmul.f32 %v606_v55, %v3474_v31 }
 0x10b   : > { %4677 = vst [vmem:[#allocation54_spill] sm:$0xff] %v3614_v7  ;;  %v613_v12 = vmul.f32 %v583_v41, %v3485_v28  ;;  %v4682_v20 = vrot.slane %v3556_v63, 2  ;;  %v4683_v60 = vrot.slane %v3416_v53, 2  ;;  %v3641_v51 = vmul.f32 %v2813_v42, %v1004_v17  ;;  %v3659_v42 = vld [vmem:[%s4496_s2] ss:$0 sm:$0xff] }
 0x10c   : > { %v1388_v4 = vsel %vm1106_vm4, %v4681_v13, %v4680_v14  ;;  %v3643_v6 = vadd.f32 %v1262_v11, %v1175_v15  ;;  %v4684_v32 = vrot.slane %v3568_v19, 2  ;;  %v4685_v14 = vrot.slane %v3334_v59, 2 }
 0x10d   : > { %v1237_v34 = vsel %vm1229_vm10, %v4683_v60, %v4682_v20  ;;  %v1165_v55 = vadd.f32 %v1114_v26, %v3413_v9  ;;  %v3654_v41 = vmul.f32 %v2803_v35, %v1004_v17  ;;  %v666_v53 = vmul.f32 0.044715, %v636_v18 }
 0x10e   : > { %v3650_v24 = vsel %vm1229_vm10, %v4685_v14, %v4684_v32  ;;  %v506_v15 = vadd.f32 %v3659_v42, %v505_v8  ;;  %v1442_v11 = vadd.f32 %v1388_v4, %v3445_v3  ;;  %v4687_v59 = vrot.slane %v3583_v25, 2  ;;  %v525_v3 = vpop.f32.mrf.mxu2 }
 0x10f   : > { %4686 = vst [vmem:[#allocation55_spill] sm:$0xff] %v3650_v24  ;;  %v4688_v13 = vrot.slane %v3451_v61, 2  ;;  %v643_v26 = vmul.f32 0.044715, %v613_v12  ;;  %v1310_v18 = vmul.f32 %v2952_v47, %v1004_v17  ;;  %v3671_v60 = vmul.f32 %v2826_v45, %v1004_v17 }
 0x110   : > { %v3674_v32 = vmul.f32 %v2832_v50, %v1004_v17  ;;  %v808_v8 = vmul.f32 %v778_v27, %v3513_v49  ;;  %v3678_v4 = vmul.f32 %v2859_v38, %v1004_v17  ;;  %v3681_v61 = vmul.f32 %v2870_v62, %v1004_v17 }
 0x111   : > { %v1510_v20 = vsel %vm1229_vm10, %v4688_v13, %v4687_v59  ;;  %v696_v14 = vadd.f32 %v666_v53, %v3474_v31  ;;  %v3689_v59 = vadd.f32 %v1237_v34, %v1165_v55  ;;  %v3694_v27 = vmul.f32 %v2870_v62, %v3460_v36  ;;  %v4693_v31 = vld [vmem:[#allocation17_spill] sm:$0xff] }
 0x112   : > { %4689 = vst [vmem:[#allocation56_spill] sm:$0xff] %v3674_v32  ;;  %v591_v13 = vmul.f32 %v506_v15, %v506_v15  ;;  %v3697_v9 = vmul.f32 %v2965_v56, %v1004_v17  ;;  %v673_v16 = vadd.f32 %v643_v26, %v3485_v28  ;;  %v3701_v7 = vadd.f32 %v3659_v42, %v525_v3  ;;  %v4696_v28 = vld [vmem:[#allocation19_spill] sm:$0xff] }
 0x113   : > { %4690 = vst [vmem:[#allocation57_spill] sm:$0xff] %v3678_v4  ;;  %v726_v24 = vmul.f32 0.7978846, %v696_v14  ;;  %v3703_v12 = vadd.f32 %v1510_v20, %v1442_v11  ;;  %v3706_v34 = vadd.f32 %v1310_v18, %v4693_v31  ;;  %v1012_v53 = vsel %vm922_vm3, %v808_v8, 0.0  ;;  %v488_v11 = vpop.f32.mrf.mxu0  ;;  %v508_v8 = vpop.f32.mrf.mxu1 }
 0x114   : > { %4691 = vst [vmem:[#allocation58_spill] sm:$0xff] %v3681_v61  ;;  %v4695_v14 = vrot.slane %v3587_v58, 1  ;;  %v4697_v26 = vrot.slane %v4696_v28, 1  ;;  %v703_v18 = vmul.f32 0.7978846, %v673_v16  ;;  %v621_v31 = vmul.f32 %v591_v13, %v506_v15  ;;  %v545_v16 = vpop.f32.mrf.mxu3 }
 0x115   : > { %4692 = vst [vmem:[#allocation59_spill] sm:$0xff] %v3697_v9  ;;  %2472 = vtanh.f32 %v726_v24  ;;  %v1078_v36 = vmul.f32 %v2788_v30, %v1012_v53  ;;  %v1201_v49 = vmul.f32 %v2803_v35, %v1012_v53  ;;  %v3722_v55 = vmul.f32 0.5, %v506_v15 }
 0x116   : > { %4694 = vst [vmem:[#allocation17_spill] sm:$0xff] %v3706_v34  ;;  %v3717_v3 = vsel %vm1106_vm4, %v4697_v26, %v4695_v14  ;;  %v599_v17 = vmul.f32 %v3701_v7, %v3701_v7  ;;  %v1355_v28 = vmul.f32 %v2826_v45, %v1012_v53  ;;  %2474 = vtanh.f32 %v703_v18 }
 0x117   : > { %4698 = vst [vmem:[#allocation19_spill] sm:$0xff] %v3717_v3  ;;  %v651_v14 = vmul.f32 0.044715, %v621_v31  ;;  %v3728_v26 = vadd.f32 %v3659_v42, %v488_v11  ;;  %v1477_v24 = vmul.f32 %v2832_v50, %v1012_v53  ;;  %v3733_v30 = vadd.s32 7, %v2723_v48 }
 0x118   : > { %v629_v13 = vmul.f32 %v599_v17, %v3701_v7  ;;  %v3736_v35 = vadd.f32 %v3659_v42, %v508_v8  ;;  %v1630_v20 = vmul.f32 %v2859_v38, %v1012_v53  ;;  %v1752_v45 = vmul.f32 %v2870_v62, %v1012_v53 }
 0x119   : > { %v681_v18 = vadd.f32 %v651_v14, %v506_v15  ;;  %v584_v11 = vmul.f32 %v3728_v26, %v3728_v26  ;;  %v1140_v31 = vrot.slane %v1078_v36, 1  ;;  %v1263_v3 = vrot.slane %v1201_v49, 2 }
 0x11a   : > { %v659_v50 = vmul.f32 0.044715, %v629_v13  ;;  %v592_v17 = vmul.f32 %v3736_v35, %v3736_v35  ;;  %v1414_v9 = vrot.slane %v1355_v28, 1  ;;  %v3746_v4 = vadd.f32 %v3659_v42, %v545_v16 }
 0x11b   : > { %v2473_v48 = vpop.eup %2472  ;;  %v711_v61 = vmul.f32 0.7978846, %v681_v18  ;;  %v614_v8 = vmul.f32 %v584_v11, %v3728_v26  ;;  %v1536_v38 = vrot.slane %v1477_v24, 2  ;;  %v1687_v49 = vrot.slane %v1630_v20, 1 }
 0x11c   : > { %v786_v62 = vadd.f32 1.0, %v2473_v48  ;;  %v689_v15 = vadd.f32 %v659_v50, %v3701_v7  ;;  %v622_v53 = vmul.f32 %v592_v17, %v3736_v35  ;;  %v2475_v36 = vpop.eup %2474  ;;  %v1809_v14 = vrot.slane %v1752_v45, 2 }
 0x11d   : > { %2476 = vtanh.f32 %v711_v61  ;;  %v644_v13 = vmul.f32 0.044715, %v614_v8  ;;  %v4699_v32 = vrot.slane %v3495_v5, 1  ;;  %v763_v18 = vadd.f32 1.0, %v2475_v36 }
 0x11e   : > { %v719_v11 = vmul.f32 0.7978846, %v689_v15  ;;  %v652_v34 = vmul.f32 0.044715, %v622_v53  ;;  %v4700_v16 = vrot.slane %v3533_v29, 1  ;;  %v816_v50 = vmul.f32 %v786_v62, %v3518_v22 }
 0x11f   : > { %v1141_v28 = vsel %vm1106_vm4, %v4699_v32, %v1140_v31  ;;  %v674_v61 = vadd.f32 %v644_v13, %v3728_v26  ;;  %v607_v5 = vmul.f32 %v3746_v4, %v3746_v4  ;;  %v528_v32 = vpop.f32.mrf.mxu2  ;;  %v4701_v20 = vrot.slane %v3529_v44, 2 }
 0x120   : > { %v1415_v24 = vsel %vm1106_vm4, %v4700_v16, %v1414_v9  ;;  %v4702_v29 = vrot.slane %v3694_v27, 2  ;;  %v4703_v9 = vld [vmem:[#allocation43_spill] sm:$0xff]  ;;  %v793_v43 = vmul.f32 %v763_v18, %v3539_v23  ;;  %2478 = vtanh.f32 %v719_v11 }
 0x121   : > { %v1264_v45 = vsel %vm1229_vm10, %v4701_v20, %v1263_v3  ;;  %v4704_v31 = vrot.slane %v4703_v9, 2  ;;  %v1176_v17 = vadd.f32 %v1141_v28, %v3564_v37  ;;  %v4706_v48 = vrot.slane %v3568_v19, 2  ;;  %v3835_v20 = vld [vmem:[%s4497_s3 + $0x2] ss:$0 sm:$0xff] }
 0x122   : > { %v704_v62 = vmul.f32 0.7978846, %v674_v61  ;;  %v682_v44 = vadd.f32 %v652_v34, %v3736_v35  ;;  %v1453_v3 = vadd.f32 %v1415_v24, %v3594_v1  ;;  %v4707_v15 = vrot.slane %v3587_v58, 1  ;;  %v3799_v58 = vld [vmem:[%s4497_s3 + $0x1] ss:$0 sm:$0xff] }
 0x123   : > { %v3772_v22 = vsel %vm1229_vm10, %v4704_v31, %v4702_v29  ;;  %v1537_v8 = vsel %vm1229_vm10, %v4706_v48, %v1536_v38  ;;  %v997_v36 = vsel %vm907_vm15, %v793_v43, 0.0  ;;  %v3787_v23 = vadd.f32 %v3659_v42, %v528_v32  ;;  %v2477_v13 = vpop.eup %2476 }
 0x124   : > { %4705 = vst [vmem:[#allocation43_spill] sm:$0xff] %v3772_v22  ;;  %v3784_v53 = vsel %vm1106_vm4, %v4707_v15, %v1687_v49  ;;  %v4708_v37 = vmov %v4702_v29  ;;  %v1020_v34 = vsel %vm3469_vm0, %v816_v50, 0.0  ;;  %v1063_v1 = vmul.f32 %v3799_v58, %v997_v36  ;;  %v3806_v49 = vld [vmem:[%s4497_s3 + $0x4] ss:$0 sm:$0xff]  ;;  %v3817_v50 = vld [vmem:[%s4497_s3 + $0x7] ss:$0 sm:$0xff] }
 0x125   : > { %v3792_v19 = vsel %vm1229_vm10, %v4708_v37, %v1809_v14  ;;  %v637_v38 = vmul.f32 %v607_v5, %v3746_v4  ;;  %v1340_v27 = vmul.f32 %v3806_v49, %v997_v36  ;;  %vm843_vm1 = vcmp.ge.s32.totalorder %v3733_v30, 0  ;;  %v3825_v5 = vld [vmem:[%s4497_s3 + $0x8] ss:$0 sm:$0xff]  ;;  %v3841_v29 = vld [vmem:[%s4497_s3 + $0x5] ss:$0 sm:$0xff] }
 0x126   : > { %vm853_vm14 = vcmp.lt.s32.totalorder %v3733_v30, 16  ;;  %2480 = vtanh.f32 %v704_v62  ;;  %v1115_v14 = vrot.slane %v1063_v1, 1  ;;  %v771_v28 = vadd.f32 1.0, %v2477_v13  ;;  %v2479_v16 = vpop.eup %2478 }
 0x127   : > { %v569_v18 = vmul.f32 0.5, %v3701_v7  ;;  %v712_v11 = vmul.f32 0.7978846, %v682_v44  ;;  %v3812_v24 = vadd.f32 %v1264_v45, %v1176_v17  ;;  %v3820_v61 = vmul.f32 %v3817_v50, %v1020_v34  ;;  %vm3848_vm2 = vmand %vm843_vm1, %vm853_vm14  ;;  %v4713_v44 = vld [vmem:[#allocation12_spill] sm:$0xff] }
 0x128   : > { %v3828_v32 = vmul.f32 %v3825_v5, %v1020_v34  ;;  %v600_v7 = vmul.f32 %v3787_v23, %v3787_v23  ;;  %v1186_v45 = vmul.f32 %v3835_v20, %v997_v36  ;;  %v1462_v9 = vmul.f32 %v3841_v29, %v997_v36  ;;  %vm890_vm9 = vmand %vm3848_vm2, %vm866_vm6 }
 0x129   : > { %4709 = vst [vmem:[#allocation60_spill] sm:$0xff] %v3812_v24  ;;  %v779_v31 = vadd.f32 1.0, %v2479_v16  ;;  %v667_v17 = vmul.f32 0.044715, %v637_v38  ;;  %v3852_v48 = vadd.f32 %v1537_v8, %v1453_v3  ;;  %v1389_v62 = vrot.slane %v1340_v27, 1  ;;  %v490_v38 = vpop.f32.mrf.mxu0 }
 0x12a   : > { %v3856_v15 = vmul.f32 %v2952_v47, %v4713_v44  ;;  %v3860_v36 = vmul.f32 %v2965_v56, %v4713_v44  ;;  %v4714_v13 = vrot.slane %v3536_v33, 1  ;;  %v801_v37 = vmul.f32 %v771_v28, %v3722_v55 }
 0x12b   : > { %4712 = vst [vmem:[#allocation61_spill] sm:$0xff] %v3852_v48  ;;  %v809_v1 = vmul.f32 %v779_v31, %v569_v18  ;;  %2482 = vtanh.f32 %v712_v11  ;;  %v4538_v3 = vrot.slane %v3820_v61, 1  ;;  %v4537_v27 = vrot.slane %v3828_v32, 2 }
 0x12c   : > { %v1116_v30 = vsel %vm1106_vm4, %v4714_v13, %v1115_v14  ;;  %v2481_v8 = vpop.eup %2480  ;;  %v554_v47 = vmul.f32 0.5, %v3728_v26  ;;  %v630_v56 = vmul.f32 %v600_v7, %v3787_v23  ;;  %v1238_v33 = vrot.slane %v1186_v45, 2 }
 0x12d   : > { %v1511_v14 = vrot.slane %v1462_v9, 2  ;;  %v562_v55 = vmul.f32 0.5, %v3736_v35  ;;  %v697_v28 = vadd.f32 %v667_v17, %v3746_v4  ;;  %v1166_v18 = vadd.f32 %v1116_v30, %v3602_v10 }
 0x12e   : > { %v4715_v11 = vrot.slane %v3548_v0, 1  ;;  %v3881_v31 = vmul.f32 0.5, %v3787_v23  ;;  %v3884_v44 = vadd.f32 %v3659_v42, %v490_v38  ;;  %v3888_v26 = vsel %vm3522_vm13, %v801_v37, 0.0  ;;  %v3896_v0 = vld [vmem:[%s4497_s3 + $0x6] ss:$0 sm:$0xff]  ;;  %vm931_vm13 = vmand %vm3469_vm0, %vm901_vm8 }
 0x12f   : > { %v1013_v7 = vsel %vm890_vm9, %v809_v1, 0.0  ;;  %v764_v35 = vadd.f32 1.0, %v2481_v8  ;;  %v3891_v45 = vmul.f32 0.5, %v3746_v4  ;;  %v3899_v10 = vmul.f32 %v3896_v0, %v1020_v34 }
 0x130   : > { %v1390_v16 = vsel %vm1106_vm4, %v4715_v11, %v1389_v62  ;;  %v4717_v9 = vrot.slane %v3553_v57, 1  ;;  %v4719_v4 = vrot.slane %v3571_v40, 2  ;;  %v3915_v13 = vmul.f32 0.044715, %v630_v56 }
 0x131   : > { %4716 = vst [vmem:[#allocation12_spill] sm:$0xff] %v3899_v10  ;;  %v2483_v30 = vpop.eup %2482  ;;  %v4721_v34 = vrot.slane %v3556_v63, 2  ;;  %v1443_v1 = vadd.f32 %v1390_v16, %v3622_v54  ;;  %v4722_v57 = vrot.slane %v3583_v25, 2  ;;  %v727_v8 = vmul.f32 0.7978846, %v697_v28 }
 0x132   : > { %v3906_v17 = vsel %vm1106_vm4, %v4717_v9, %v4538_v3  ;;  %v3913_v62 = vsel %vm1229_vm10, %v4719_v4, %v4537_v27  ;;  %v3928_v40 = vmul.f32 %v3896_v0, %v3888_v26  ;;  %v3931_v56 = vmul.f32 %v3799_v58, %v1013_v7  ;;  %v3936_v63 = vld [vmem:[%s4497_s3] ss:$0 sm:$0xff] }
 0x133   : > { %4718 = vst [vmem:[#allocation62_spill] sm:$0xff] %v3906_v17  ;;  %v1239_v37 = vsel %vm1229_vm10, %v4721_v34, %v1238_v33  ;;  %v1512_v38 = vsel %vm1229_vm10, %v4722_v57, %v1511_v14  ;;  %v1033_v54 = vmul.f32 %v3936_v63, %v3888_v26  ;;  %v3941_v25 = vmul.f32 %v3835_v20, %v1013_v7  ;;  %v3946_v33 = vld [vmem:[%s4497_s3 + $0x3] ss:$0 sm:$0xff] }
 0x134   : > { %4720 = vst [vmem:[#allocation63_spill] sm:$0xff] %v3913_v62  ;;  %v3924_v11 = vadd.f32 %v1239_v37, %v1166_v18  ;;  %v1316_v14 = vmul.f32 %v3946_v33, %v1013_v7  ;;  %v3950_v28 = vmul.f32 %v3806_v49, %v1013_v7  ;;  %v794_v18 = vmul.f32 %v764_v35, %v554_v47 }
 0x135   : > { %4723 = vst [vmem:[#allocation64_spill] sm:$0xff] %v3928_v40  ;;  %v3953_v16 = vmul.f32 %v3841_v29, %v1013_v7  ;;  %v3956_v9 = vmul.f32 %v3817_v50, %v1013_v7  ;;  %v3959_v4 = vmul.f32 %v3825_v5, %v1013_v7  ;;  %v772_v37 = vadd.f32 1.0, %v2483_v30 }
 0x136   : > { %4724 = vst [vmem:[#allocation65_spill] sm:$0xff] %v3931_v56  ;;  %v3967_v57 = vmul.f32 %v3799_v58, %v3888_v26  ;;  %v3971_v47 = vmul.f32 %v3835_v20, %v3888_v26  ;;  %v1311_v35 = vmul.f32 %v3946_v33, %v3888_v26  ;;  %v3977_v27 = vmul.f32 %v3806_v49, %v3888_v26 }
 0x137   : > { %4725 = vst [vmem:[#allocation66_spill] sm:$0xff] %v3941_v25  ;;  %v3979_v3 = vadd.f32 %v1512_v38, %v1443_v1  ;;  %v3982_v62 = vmul.f32 %v3936_v63, %v1013_v7  ;;  %v3986_v17 = vmul.f32 %v3896_v0, %v1013_v7  ;;  %v3990_v48 = vadd.f32 %v1316_v14, %v3643_v6  ;;  %v4734_v14 = vld [vmem:[#allocation50_spill] sm:$0xff] }
 0x138   : > { %4726 = vst [vmem:[#allocation67_spill] sm:$0xff] %v3950_v28  ;;  %v998_v22 = vsel %vm875_vm12, %v794_v18, 0.0  ;;  %v802_v30 = vmul.f32 %v772_v37, %v562_v55  ;;  %v1128_v10 = vrot.slane %v3967_v57, 1  ;;  %v1251_v6 = vrot.slane %v3971_v47, 2 }
 0x139   : > { %4727 = vst [vmem:[#allocation68_spill] sm:$0xff] %v3953_v16  ;;  %v1402_v18 = vrot.slane %v3977_v27, 1  ;;  %v4005_v24 = vmul.f32 %v3799_v58, %v998_v22  ;;  %v4011_v1 = vmul.f32 %v3841_v29, %v3888_v26  ;;  %2484 = vtanh.f32 %v727_v8 }
 0x13a   : > { %4728 = vst [vmem:[#allocation69_spill] sm:$0xff] %v3956_v9  ;;  %v4007_v52 = vsel %vm916_vm5, %v802_v30, 0.0  ;;  %v4014_v55 = vmul.f32 %v3835_v20, %v998_v22  ;;  %v4023_v47 = vmul.f32 %v3936_v63, %v998_v22  ;;  %v4027_v30 = vmul.f32 %v3806_v49, %v998_v22 }
 0x13b   : > { %4729 = vst [vmem:[#allocation70_spill] sm:$0xff] %v3959_v4  ;;  %v1072_v37 = vmul.f32 %v3799_v58, %v4007_v52  ;;  %v1195_v57 = vmul.f32 %v3835_v20, %v4007_v52  ;;  %v1349_v27 = vmul.f32 %v3806_v49, %v4007_v52  ;;  %v1471_v8 = vmul.f32 %v3841_v29, %v4007_v52 }
 0x13c   : > { %4731 = vst [vmem:[#allocation4_spill] sm:$0xff] %v3982_v62  ;;  %v1582_v16 = vmul.f32 %v3896_v0, %v998_v22  ;;  %v1524_v40 = vrot.slane %v4011_v1, 2 }
 0x13d   : > { %4732 = vst [vmem:[#allocation71_spill] sm:$0xff] %v3986_v17  ;;  %v1327_v17 = vadd.f32 %v1311_v35, %v4734_v14  ;;  %v1306_v35 = vmul.f32 %v3946_v33, %v998_v22  ;;  %v4032_v14 = vmul.f32 %v3841_v29, %v998_v22  ;;  %v1130_v7 = vrot.slane %v1072_v37, 1 }
 0x13e   : > { %4733 = vst [vmem:[#allocation72_spill] sm:$0xff] %v3990_v48  ;;  %v1253_v38 = vrot.slane %v1195_v57, 2  ;;  %v1404_v4 = vrot.slane %v1349_v27, 1  ;;  %v4037_v48 = vmul.f32 %v3817_v50, %v998_v22  ;;  %v1526_v28 = vrot.slane %v1471_v8, 2 }
 0x13f   : > { %4735 = vst [vmem:[#allocation50_spill] sm:$0xff] %v4014_v55  ;;  %v1131_v62 = vsel %vm1106_vm4, %v1128_v10, %v1130_v7  ;;  %v2485_v2 = vpop.eup %2484  ;;  %v4044_v37 = vadd.f32 %v1306_v35, %v3689_v59  ;;  %v4047_v57 = vmul.f32 %v3825_v5, %v998_v22  ;;  %v1391_v55 = vrot.slane %v4027_v30, 1 }
 0x140   : > { %4736 = vst [vmem:[#allocation73_spill] sm:$0xff] %v4023_v47  ;;  %v1405_v56 = vsel %vm1106_vm4, %v1402_v18, %v1404_v4  ;;  %v1172_v27 = vadd.f32 %v1131_v62, %v1033_v54  ;;  %v510_v47 = vpop.f32.mrf.mxu1  ;;  %v1254_v8 = vsel %vm1229_vm10, %v1251_v6, %v1253_v38  ;;  %v1527_v7 = vsel %vm1229_vm10, %v1524_v40, %v1526_v28 }
 0x141   : > { %v1449_v9 = vadd.f32 %v1405_v56, %v1327_v17  ;;  %v787_v25 = vadd.f32 1.0, %v2485_v2  ;;  %v690_v4 = vadd.f32 %v3915_v13, %v3787_v23  ;;  %v585_v22 = vmul.f32 %v3884_v44, %v3884_v44 }
 0x142   : > { %v1295_v59 = vadd.f32 %v1254_v8, %v1172_v27  ;;  %v1513_v17 = vrot.slane %v4032_v14, 2  ;;  %v4060_v62 = vadd.f32 %v1582_v16, %v3703_v12  ;;  %v4063_v54 = vadd.f32 %v3659_v42, %v510_v47  ;;  %v4739_v47 = vld [vmem:[#allocation29_spill] sm:$0xff]  ;;  %v4740_v8 = vld [vmem:[#allocation31_spill] sm:$0xff] }
 0x143   : > { %v1571_v35 = vadd.f32 %v1527_v7, %v1449_v9  ;;  %v720_v56 = vmul.f32 0.7978846, %v690_v4  ;;  %v4737_v2 = vrot.slane %v3626_v39, 1  ;;  %v615_v9 = vmul.f32 %v585_v22, %v3884_v44 }
 0x144   : > { %v1329_v13 = vadd.f32 %v3856_v15, %v1295_v59  ;;  %v4738_v38 = vrot.slane %v3671_v60, 1  ;;  %v817_v12 = vmul.f32 %v787_v25, %v3891_v45  ;;  %v593_v16 = vmul.f32 %v4063_v54, %v4063_v54  ;;  %v4084_v60 = vld [vmem:[%s4498_s4] ss:$0 sm:$0xff]  ;;  %v530_v59 = vpop.f32.mrf.mxu2 }
 0x145   : > { %v1129_v23 = vsel %vm1106_vm4, %v4737_v2, %v1128_v10  ;;  %v1605_v28 = vadd.f32 %v3860_v36, %v1571_v35  ;;  %2486 = vtanh.f32 %v720_v56  ;;  %v1664_v39 = vrot.slane %v4037_v48, 1  ;;  %v4742_v35 = vld [vmem:[#allocation17_spill] sm:$0xff]  ;;  %v4743_v56 = vld [vmem:[#allocation30_spill] sm:$0xff] }
 0x146   : > { %v1403_v27 = vsel %vm1106_vm4, %v4738_v38, %v1402_v18  ;;  %v1786_v10 = vrot.slane %v4047_v57, 2  ;;  %v1451_v15 = vadd.f32 %v4739_v47, %v1329_v13  ;;  %v1171_v45 = vadd.f32 %v1129_v23, %v3641_v51 }
 0x147   : > { %v1727_v36 = vadd.f32 %v4740_v8, %v1605_v28  ;;  %v4741_v25 = vrot.slane %v3654_v41, 2  ;;  %v645_v7 = vmul.f32 0.044715, %v615_v9  ;;  %v623_v4 = vmul.f32 %v593_v16, %v4063_v54  ;;  %v4744_v28 = vld [vmem:[#allocation32_spill] sm:$0xff] }
 0x148   : > { %v1448_v22 = vadd.f32 %v1403_v27, %v4742_v35  ;;  %v1573_v2 = vadd.f32 %v4743_v56, %v1451_v15  ;;  %v1623_v13 = vmul.f32 %v3817_v50, %v3888_v26  ;;  %v1021_v38 = vsel %vm931_vm13, %v817_v12, 0.0 }
 0x149   : > { %v1252_v18 = vsel %vm1229_vm10, %v4741_v25, %v1251_v6  ;;  %v1849_v21 = vadd.f32 %v4744_v28, %v1727_v36  ;;  %v675_v51 = vadd.f32 %v645_v7, %v3884_v44  ;;  %v653_v23 = vmul.f32 0.044715, %v623_v4  ;;  %v4745_v6 = vld [vmem:[#allocation52_spill] sm:$0xff] }
 0x14a   : > { %v531_v41 = vadd.f32 %v3659_v42, %v530_v59  ;;  %v1607_v9 = vadd.f32 %v4745_v6, %v1573_v2  ;;  %v1624_v16 = vmul.f32 %v3817_v50, %v4007_v52  ;;  %v1745_v27 = vmul.f32 %v3825_v5, %v3888_v26 }
 0x14b   : > { %v1869_v47 = vadd.f32 %v4084_v60, %v1849_v21  ;;  %v2487_v15 = vpop.eup %2486  ;;  %v1746_v8 = vmul.f32 %v3825_v5, %v4007_v52  ;;  %v705_v12 = vmul.f32 0.7978846, %v675_v51  ;;  %v683_v36 = vadd.f32 %v653_v23, %v4063_v54 }
 0x14c   : > { %v601_v25 = vmul.f32 %v531_v41, %v531_v41  ;;  %v1729_v42 = vadd.f32 %v3784_v53, %v1607_v9  ;;  %v1639_v4 = vmul.f32 %v3817_v50, %v1021_v38  ;;  %v1761_v59 = vmul.f32 %v3825_v5, %v1021_v38  ;;  %v4746_v53 = vld [vmem:[#allocation56_spill] sm:$0xff] }
 0x14d   : > { %v1901_v7 = vmul.f32 %v1869_v47, %v1869_v47  ;;  %v780_v35 = vadd.f32 1.0, %v2487_v15  ;;  %2488 = vtanh.f32 %v705_v12  ;;  %v713_v26 = vmul.f32 0.7978846, %v683_v36 }
 0x14e   : > { %v631_v56 = vmul.f32 %v601_v25, %v531_v41  ;;  %v4114_v2 = vadd.f32 %v1252_v18, %v1171_v45  ;;  %v1675_v28 = vrot.slane %v1623_v13, 1  ;;  %v1851_v52 = vadd.f32 %v3792_v19, %v1729_v42 }
 0x14f   : > { %v1917_v21 = vmul.f32 %v1901_v7, %v1869_v47  ;;  %v1677_v51 = vrot.slane %v1624_v16, 1  ;;  %v1797_v23 = vrot.slane %v1745_v27, 2  ;;  %2490 = vtanh.f32 %v713_v26  ;;  %v4748_v16 = vld [vmem:[#allocation57_spill] sm:$0xff] }
 0x150   : > { %v661_v6 = vmul.f32 0.044715, %v631_v56  ;;  %v4747_v9 = vrot.slane %v4746_v53, 2  ;;  %v1799_v15 = vrot.slane %v1746_v8, 2  ;;  %v1871_v12 = vadd.f32 %v4084_v60, %v1851_v52  ;;  %v4750_v8 = vld [vmem:[#allocation58_spill] sm:$0xff] }
 0x151   : > { %v1933_v36 = vmul.f32 0.044715, %v1917_v21  ;;  %v1702_v45 = vrot.slane %v1639_v4, 1  ;;  %v1824_v18 = vrot.slane %v1761_v59, 2  ;;  %v810_v13 = vmul.f32 %v780_v35, %v3881_v31 }
 0x152   : > { %v1525_v38 = vsel %vm1229_vm10, %v4747_v9, %v1524_v40  ;;  %v691_v19 = vadd.f32 %v661_v6, %v531_v41  ;;  %v4749_v27 = vrot.slane %v4748_v16, 1  ;;  %v1903_v1 = vmul.f32 %v1871_v12, %v1871_v12 }
 0x153   : > { %v4124_v25 = vadd.f32 %v1525_v38, %v1448_v22  ;;  %v1949_v7 = vadd.f32 %v1933_v36, %v1869_v47  ;;  %v2489_v26 = vpop.eup %2488  ;;  %v4132_v40 = vsel %vm1106_vm4, %v1675_v28, %v1677_v51  ;;  %v4751_v56 = vrot.slane %v4750_v8, 2 }
 0x154   : > { %v4129_v42 = vsel %vm1106_vm4, %v4749_v27, %v1675_v28  ;;  %v555_v31 = vmul.f32 0.5, %v3884_v44  ;;  %v721_v22 = vmul.f32 0.7978846, %v691_v19  ;;  %v4141_v59 = vsel %vm1229_vm10, %v1797_v23, %v1799_v15 }
 0x155   : > { %v4137_v4 = vsel %vm1229_vm10, %v4751_v56, %v1797_v23  ;;  %v1919_v35 = vmul.f32 %v1903_v1, %v1871_v12  ;;  %v1965_v52 = vmul.f32 0.7978846, %v1949_v7  ;;  %v765_v21 = vadd.f32 1.0, %v2489_v26  ;;  %v2491_v6 = vpop.eup %2490 }
 0x156   : > { %v4752_v53 = vrot.slane %v3820_v61, 1  ;;  %v4753_v51 = vrot.slane %v3828_v32, 2  ;;  %v4155_v44 = vsel %vm3848_vm2, %v810_v13, 0.0  ;;  %v563_v23 = vmul.f32 0.5, %v4063_v54 }
 0x157   : > { %v1935_v38 = vmul.f32 0.044715, %v1919_v35  ;;  %2492 = vtanh.f32 %v1965_v52  ;;  %v795_v15 = vmul.f32 %v765_v21, %v555_v31  ;;  %v773_v36 = vadd.f32 1.0, %v2491_v6 }
 0x158   : > { %v4146_v28 = vsel %vm1106_vm4, %v4752_v53, %v1702_v45  ;;  %v4151_v9 = vsel %vm1229_vm10, %v4753_v51, %v1824_v18  ;;  %v1885_v19 = vmul.f32 0.5, %v1869_v47  ;;  %v1887_v61 = vmul.f32 0.5, %v1871_v12 }
 0x159   : > { %v4158_v16 = vmul.f32 0.5, %v531_v41  ;;  %2494 = vtanh.f32 %v721_v22  ;;  %v1951_v45 = vadd.f32 %v1935_v38, %v1871_v12  ;;  %v999_v32 = vsel %vm2764_vm7, %v795_v15, 0.0  ;;  %v4755_v38 = vld [vmem:[#allocation5_spill] sm:$0xff]  ;;  %vm884_vm7 = vmand %vm2938_vm11, %vm866_vm6 }
 0x15a   : > { %v803_v18 = vmul.f32 %v773_v36, %v563_v23  ;;  %v4164_v13 = vmul.f32 %v3936_v63, %v4155_v44  ;;  %v1029_v54 = vmul.f32 %v3936_v63, %v999_v32  ;;  %v1065_v27 = vmul.f32 %v3799_v58, %v999_v32  ;;  %vm925_vm6 = vmand %vm3848_vm2, %vm901_vm8 }
 0x15b   : > { %v1188_v1 = vmul.f32 %v3835_v20, %v999_v32  ;;  %v1307_v47 = vmul.f32 %v3946_v33, %v999_v32  ;;  %v1967_v41 = vmul.f32 0.7978846, %v1951_v45  ;;  %v1342_v7 = vmul.f32 %v3806_v49, %v999_v32 }
 0x15c   : > { %v1464_v12 = vmul.f32 %v3841_v29, %v999_v32  ;;  %v1583_v34 = vmul.f32 %v3896_v0, %v999_v32  ;;  %v1118_v26 = vrot.slane %v1065_v27, 1  ;;  %v1617_v31 = vmul.f32 %v3817_v50, %v999_v32 }
 0x15d   : > { %v1241_v8 = vrot.slane %v1188_v1, 2  ;;  %v1323_v56 = vadd.f32 %v1307_v47, %v3924_v11  ;;  %v2493_v22 = vpop.eup %2492  ;;  %2496 = vtanh.f32 %v1967_v41  ;;  %v1392_v35 = vrot.slane %v1342_v7, 1  ;;  %v4757_v11 = vld [vmem:[#allocation50_spill] sm:$0xff]  ;;  %v4759_v1 = vld [vmem:[#allocation73_spill] sm:$0xff] }
 0x15e   : > { %v1514_v52 = vrot.slane %v1464_v12, 2  ;;  %v1599_v21 = vadd.f32 %v1583_v34, %v3979_v3  ;;  %v1997_v53 = vadd.f32 1.0, %v2493_v22  ;;  %v4754_v51 = vrot.slane %v4005_v24, 1  ;;  %v4760_v7 = vld [vmem:[#allocation6_spill] sm:$0xff]  ;;  %v4774_v22 = vld [vmem:[#allocation27_spill] sm:$0xff] }
 0x15f   : > { %v4176_v6 = vpop.eup %2494  ;;  %v4756_v15 = vrot.slane %v4755_v38, 1  ;;  %v4758_v45 = vrot.slane %v4757_v11, 2  ;;  %v4761_v3 = vrot.slane %v4760_v7, 2  ;;  %v1393_v24 = vsel %vm1106_vm4, %v1391_v55, %v1392_v35 }
 0x160   : > { %v1119_v23 = vsel %vm1106_vm4, %v4754_v51, %v1118_v26  ;;  %v4764_v51 = vld [vmem:[#allocation7_spill] sm:$0xff]  ;;  %v4211_v7 = vsel %vm884_vm7, %v803_v18, 0.0  ;;  %v1317_v46 = vmul.f32 %v3946_v33, %v4155_v44 }
 0x161   : > { %v1121_v36 = vsel %vm1106_vm4, %v1118_v26, %v4756_v15  ;;  %v1242_v27 = vsel %vm1229_vm10, %v4758_v45, %v1241_v8  ;;  %v1167_v47 = vadd.f32 %v1119_v23, %v4759_v1  ;;  %v1244_v12 = vsel %vm1229_vm10, %v1241_v8, %v4761_v3  ;;  %v4768_v3 = vld [vmem:[#allocation16_spill] sm:$0xff] }
 0x162   : > { %v1168_v41 = vadd.f32 %v1121_v36, %v1029_v54  ;;  %v4198_v26 = vmul.f32 %v1997_v53, %v1885_v19  ;;  %v4765_v38 = vrot.slane %v4764_v51, 1  ;;  %v1444_v54 = vadd.f32 %v1393_v24, %v4044_v37  ;;  %v4766_v36 = vld [vmem:[#allocation8_spill] sm:$0xff]  ;;  %v4769_v24 = vld [vmem:[#allocation39_spill] sm:$0xff] }
 0x163   : > { %v1515_v8 = vsel %vm1229_vm10, %v1513_v17, %v1514_v52  ;;  %v1290_v30 = vadd.f32 %v1242_v27, %v1167_v47  ;;  %v4767_v11 = vrot.slane %v4766_v36, 2  ;;  %v1665_v19 = vrot.slane %v1617_v31, 1  ;;  %v4770_v27 = vld [vmem:[#allocation18_spill] sm:$0xff]  ;;  %v4778_v36 = vld [vmem:[#allocation48_spill] sm:$0xff] }
 0x164   : > { %v1395_v23 = vsel %vm1106_vm4, %v1392_v35, %v4765_v38  ;;  %v1291_v15 = vadd.f32 %v1244_v12, %v1168_v41  ;;  %v1566_v1 = vadd.f32 %v1515_v8, %v1444_v54  ;;  %v1739_v53 = vmul.f32 %v3825_v5, %v999_v32  ;;  %v2497_v35 = vpop.eup %2496  ;;  %v4773_v41 = vld [vmem:[#allocation15_spill] sm:$0xff]  ;;  %v4775_v38 = vld [vmem:[#allocation40_spill] sm:$0xff] }
 0x165   : > { %v1445_v55 = vadd.f32 %v1395_v23, %v1323_v56  ;;  %v1517_v45 = vsel %vm1229_vm10, %v1514_v52, %v4767_v11  ;;  %v1324_v37 = vadd.f32 %v4768_v3, %v1290_v30  ;;  %v1034_v17 = vmul.f32 %v3936_v63, %v4211_v7  ;;  %v4771_v52 = vld [vmem:[#allocation9_spill] sm:$0xff]  ;;  %v4776_v30 = vld [vmem:[#allocation3_spill] sm:$0xff]  ;;  %v4782_v3 = vld [vmem:[#allocation20_spill] sm:$0xff] }
 0x166   : > { %v1325_v14 = vadd.f32 %v4769_v24, %v1291_v15  ;;  %v1999_v56 = vadd.f32 1.0, %v2497_v35  ;;  %v1600_v47 = vadd.f32 %v4770_v27, %v1566_v1  ;;  %v1666_v31 = vsel %vm1106_vm4, %v1664_v39, %v1665_v19  ;;  %v4783_v24 = vld [vmem:[#allocation59_spill] sm:$0xff] }
 0x167   : > { %v1567_v34 = vadd.f32 %v1517_v45, %v1445_v55  ;;  %v4772_v32 = vrot.slane %v4771_v52, 1  ;;  %v1446_v12 = vadd.f32 %v4773_v41, %v1324_v37  ;;  %v1720_v54 = vadd.f32 %v1666_v31, %v4060_v62  ;;  %v4777_v55 = vld [vmem:[#allocation28_spill] sm:$0xff]  ;;  %v4779_v45 = vld [vmem:[#allocation49_spill] sm:$0xff]  ;;  %v4780_v62 = vld [vmem:[#allocation10_spill] sm:$0xff] }
 0x168   : > { %v1447_v51 = vadd.f32 %v4774_v22, %v1325_v14  ;;  %v4228_v63 = vmul.f32 %v1999_v56, %v1887_v61  ;;  %v1722_v15 = vadd.f32 %v4776_v30, %v1600_v47  ;;  %v1787_v48 = vrot.slane %v1739_v53, 2  ;;  %v4785_v31 = vld [vmem:[#allocation51_spill] sm:$0xff] }
 0x169   : > { %v1668_v18 = vsel %vm1106_vm4, %v1665_v19, %v4772_v32  ;;  %v1601_v23 = vadd.f32 %v4775_v38, %v1567_v34  ;;  %v1568_v39 = vadd.f32 %v4777_v55, %v1446_v12  ;;  %v1073_v19 = vmul.f32 %v3799_v58, %v4211_v7  ;;  %v4784_v34 = vld [vmem:[#allocation64_spill] sm:$0xff] }
 0x16a   : > { %v1721_v8 = vadd.f32 %v1668_v18, %v1599_v21  ;;  %v1569_v11 = vadd.f32 %v4778_v36, %v1447_v51  ;;  %v1788_v35 = vsel %vm1229_vm10, %v1786_v10, %v1787_v48  ;;  %v4781_v61 = vrot.slane %v4780_v62, 2 }
 0x16b   : > { %v1723_v1 = vadd.f32 %v4779_v45, %v1601_v23  ;;  %v1844_v37 = vadd.f32 %v4782_v3, %v1722_v15  ;;  %v1196_v53 = vmul.f32 %v3835_v20, %v4211_v7  ;;  %v1602_v14 = vadd.f32 %v4783_v24, %v1568_v39 }
 0x16c   : > { %v1790_v21 = vsel %vm1229_vm10, %v1787_v48, %v4781_v61  ;;  %v1603_v56 = vadd.f32 %v4784_v34, %v1569_v11  ;;  %v1842_v27 = vadd.f32 %v1788_v35, %v1720_v54  ;;  %v1132_v10 = vrot.slane %v1073_v19, 1  ;;  %v4786_v54 = vld [vmem:[#allocation21_spill] sm:$0xff] }
 0x16d   : > { %v1843_v47 = vadd.f32 %v1790_v21, %v1721_v8  ;;  %v1845_v52 = vadd.f32 %v4785_v31, %v1723_v1  ;;  %v1864_v57 = vadd.f32 %v4084_v60, %v1844_v37  ;;  %v1255_v32 = vrot.slane %v1196_v53, 2  ;;  %v4788_v21 = vld [vmem:[#allocation22_spill] sm:$0xff] }
 0x16e   : > { %v1724_v18 = vadd.f32 %v4129_v42, %v1602_v14  ;;  %v1725_v41 = vadd.f32 %v4132_v40, %v1603_v56  ;;  %v1862_v12 = vadd.f32 %v4084_v60, %v1842_v27  ;;  %v4787_v8 = vrot.slane %v4786_v54, 1 }
 0x16f   : > { %v1863_v22 = vadd.f32 %v4084_v60, %v1843_v47  ;;  %v1865_v51 = vadd.f32 %v4084_v60, %v1845_v52  ;;  %v4254_v38 = vmul.f32 0.5, %v1864_v57  ;;  %v1896_v23 = vmul.f32 %v1864_v57, %v1864_v57 }
 0x170   : > { %v1134_v30 = vsel %vm1106_vm4, %v1132_v10, %v4787_v8  ;;  %v1846_v15 = vadd.f32 %v4137_v4, %v1724_v18  ;;  %v1847_v42 = vadd.f32 %v4141_v59, %v1725_v41  ;;  %v4261_v48 = vmul.f32 0.5, %v1862_v12 }
 0x171   : > { %v4263_v40 = vmul.f32 0.5, %v1863_v22  ;;  %v4265_v55 = vmul.f32 0.5, %v1865_v51  ;;  %v1894_v39 = vmul.f32 %v1862_v12, %v1862_v12  ;;  %v1895_v36 = vmul.f32 %v1863_v22, %v1863_v22 }
 0x172   : > { %v1897_v11 = vmul.f32 %v1865_v51, %v1865_v51  ;;  %v1866_v45 = vadd.f32 %v4084_v60, %v1846_v15  ;;  %v1867_v1 = vadd.f32 %v4084_v60, %v1847_v42  ;;  %v1912_v19 = vmul.f32 %v1896_v23, %v1864_v57  ;;  %v4790_v23 = vld [vmem:[#allocation41_spill] sm:$0xff] }
 0x173   : > { %v1173_v35 = vadd.f32 %v1134_v30, %v1034_v17  ;;  %v1910_v62 = vmul.f32 %v1894_v39, %v1862_v12  ;;  %v1911_v4 = vmul.f32 %v1895_v36, %v1863_v22  ;;  %v4789_v59 = vrot.slane %v4788_v21, 2 }
 0x174   : > { %v1913_v61 = vmul.f32 %v1897_v11, %v1865_v51  ;;  %v4273_v37 = vmul.f32 0.5, %v1866_v45  ;;  %v4275_v53 = vmul.f32 0.5, %v1867_v1  ;;  %v1898_v24 = vmul.f32 %v1866_v45, %v1866_v45 }
 0x175   : > { %v1257_v3 = vsel %vm1229_vm10, %v1255_v32, %v4789_v59  ;;  %v1899_v14 = vmul.f32 %v1867_v1, %v1867_v1  ;;  %v1926_v34 = vmul.f32 0.044715, %v1910_v62  ;;  %v1927_v56 = vmul.f32 0.044715, %v1911_v4 }
 0x176   : > { %v1928_v27 = vmul.f32 0.044715, %v1912_v19  ;;  %v1296_v17 = vadd.f32 %v1257_v3, %v1173_v35  ;;  %v1914_v47 = vmul.f32 %v1898_v24, %v1866_v45  ;;  %v1929_v52 = vmul.f32 0.044715, %v1913_v61  ;;  %v4791_v35 = vld [vmem:[#allocation54_spill] sm:$0xff] }
 0x177   : > { %v1915_v31 = vmul.f32 %v1899_v14, %v1867_v1  ;;  %v1312_v10 = vmul.f32 %v3946_v33, %v4211_v7  ;;  %v1942_v32 = vadd.f32 %v1926_v34, %v1862_v12  ;;  %v1943_v18 = vadd.f32 %v1927_v56, %v1863_v22 }
 0x178   : > { %v1944_v41 = vadd.f32 %v1928_v27, %v1864_v57  ;;  %v1330_v54 = vadd.f32 %v4790_v23, %v1296_v17  ;;  %v1930_v8 = vmul.f32 0.044715, %v1914_v47  ;;  %v1945_v15 = vadd.f32 %v1929_v52, %v1865_v51  ;;  %v4794_v17 = vld [vmem:[#allocation24_spill] sm:$0xff] }
 0x179   : > { %v1931_v30 = vmul.f32 0.044715, %v1915_v31  ;;  %v1328_v42 = vadd.f32 %v1312_v10, %v4114_v2  ;;  %v1958_v39 = vmul.f32 0.7978846, %v1942_v32  ;;  %v1959_v36 = vmul.f32 0.7978846, %v1943_v18 }
 0x17a   : > { %v1960_v11 = vmul.f32 0.7978846, %v1944_v41  ;;  %v1350_v12 = vmul.f32 %v3806_v49, %v4211_v7  ;;  %v1946_v22 = vadd.f32 %v1930_v8, %v1866_v45  ;;  %v1961_v19 = vmul.f32 0.7978846, %v1945_v15  ;;  %v4792_v45 = vld [vmem:[#allocation23_spill] sm:$0xff]  ;;  %v4796_v32 = vld [vmem:[#allocation25_spill] sm:$0xff] }
 0x17b   : > { %v1947_v57 = vadd.f32 %v1931_v30, %v1867_v1  ;;  %v4289_v62 = vadd.f32 %v4791_v35, %v1330_v54  ;;  %2498 = vtanh.f32 %v1958_v39  ;;  %v1472_v51 = vmul.f32 %v3841_v29, %v4211_v7  ;;  %v4798_v39 = vld [vmem:[#allocation42_spill] sm:$0xff]  ;;  %v4801_v35 = vld [vmem:[#allocation65_spill] sm:$0xff] }
 0x17c   : > { %v1406_v4 = vrot.slane %v1350_v12, 1  ;;  %v1588_v2 = vmul.f32 %v3896_v0, %v4211_v7  ;;  %v1962_v61 = vmul.f32 0.7978846, %v1946_v22  ;;  %2500 = vtanh.f32 %v1959_v36 }
 0x17d   : > { %v1963_v21 = vmul.f32 0.7978846, %v1947_v57  ;;  %v1625_v59 = vmul.f32 %v3817_v50, %v4211_v7  ;;  %2502 = vtanh.f32 %v1960_v11  ;;  %v4793_v1 = vrot.slane %v4792_v45, 1  ;;  %v4799_v11 = vld [vmem:[#allocation26_spill] sm:$0xff] }
 0x17e   : > { %v1528_v24 = vrot.slane %v1472_v51, 2  ;;  %v1604_v14 = vadd.f32 %v1588_v2, %v4124_v25  ;;  %2504 = vtanh.f32 %v1961_v19  ;;  %v1747_v27 = vmul.f32 %v3825_v5, %v4211_v7 }
 0x17f   : > { %v1408_v3 = vsel %vm1106_vm4, %v1406_v4, %v4793_v1  ;;  %v1679_v56 = vrot.slane %v1625_v59, 1  ;;  %2506 = vtanh.f32 %v1962_v61  ;;  %v4795_v47 = vrot.slane %v4794_v17, 2  ;;  %v4803_v59 = vld [vmem:[#allocation19_spill] sm:$0xff] }
 0x180   : > { %v1450_v34 = vadd.f32 %v1408_v3, %v1328_v42  ;;  %v781_v52 = vadd.f32 1.0, %v4176_v6  ;;  %v1080_v10 = vmul.f32 %v3799_v58, %v4155_v44  ;;  %2508 = vtanh.f32 %v1963_v21 }
 0x181   : > { %v1530_v31 = vsel %vm1229_vm10, %v1528_v24, %v4795_v47  ;;  %v4797_v18 = vrot.slane %v4796_v32, 1  ;;  %v1801_v7 = vrot.slane %v1747_v27, 2  ;;  %v2499_v23 = vpop.eup %2498  ;;  %v1203_v30 = vmul.f32 %v3835_v20, %v4155_v44 }
 0x182   : > { %v1572_v25 = vadd.f32 %v1530_v31, %v1450_v34  ;;  %v811_v54 = vmul.f32 %v781_v52, %v4158_v16  ;;  %v1143_v8 = vrot.slane %v1080_v10, 1  ;;  %v2501_v15 = vpop.eup %2500  ;;  %v1990_v42 = vadd.f32 1.0, %v2499_v23  ;;  %v4804_v34 = vld [vmem:[#allocation4_spill] sm:$0xff] }
 0x183   : > { %v1681_v41 = vsel %vm1106_vm4, %v1679_v56, %v4797_v18  ;;  %v4800_v12 = vrot.slane %v4799_v11, 2  ;;  %v2503_v43 = vpop.eup %2502  ;;  %v1991_v57 = vadd.f32 1.0, %v2501_v15  ;;  %v4802_v4 = vrot.slane %v4801_v35, 1 }
 0x184   : > { %v1726_v6 = vadd.f32 %v1681_v41, %v1604_v14  ;;  %v1606_v36 = vadd.f32 %v4798_v39, %v1572_v25  ;;  %v4330_v16 = vsel %vm925_vm6, %v811_v54, 0.0  ;;  %v2505_v2 = vpop.eup %2504  ;;  %v1992_v61 = vadd.f32 1.0, %v2503_v43  ;;  %v4806_v39 = vld [vmem:[#allocation60_spill] sm:$0xff] }
 0x185   : > { %v1803_v22 = vsel %vm1229_vm10, %v1801_v7, %v4800_v12  ;;  %v1144_v51 = vsel %vm1106_vm4, %v4802_v4, %v1143_v8  ;;  %v4336_v21 = vmul.f32 %v1990_v42, %v4261_v48  ;;  %v1081_v33 = vmul.f32 %v3799_v58, %v4330_v16  ;;  %v2507_v1 = vpop.eup %2506  ;;  %v4805_v58 = vld [vmem:[#allocation43_spill] sm:$0xff] }
 0x186   : > { %v1848_v19 = vadd.f32 %v1803_v22, %v1726_v6  ;;  %v1728_v45 = vadd.f32 %v4803_v59, %v1606_v36  ;;  %v1993_v3 = vadd.f32 1.0, %v2505_v2  ;;  %v4342_v24 = vmul.f32 %v1991_v57, %v4263_v40  ;;  %v2509_v27 = vpop.eup %2508  ;;  %v4807_v22 = vld [vmem:[#allocation66_spill] sm:$0xff]  ;;  %v4809_v59 = vld [vmem:[#allocation13_spill] sm:$0xff] }
 0x187   : > { %v1177_v56 = vadd.f32 %v1144_v51, %v4804_v34  ;;  %v1994_v48 = vadd.f32 1.0, %v2507_v1  ;;  %v4352_v17 = vmul.f32 %v1992_v61, %v4254_v38  ;;  %v1145_v31 = vrot.slane %v1081_v33, 1  ;;  %v4810_v33 = vld [vmem:[#allocation67_spill] sm:$0xff] }
 0x188   : > { %v1868_v14 = vadd.f32 %v4084_v60, %v1848_v19  ;;  %v1850_v47 = vadd.f32 %v4805_v58, %v1728_v45  ;;  %v1995_v40 = vadd.f32 1.0, %v2509_v27  ;;  %v4356_v52 = vmul.f32 %v1993_v3, %v4265_v55 }
 0x189   : > { %v2331_v10 = vpack.c.bf16 %v4342_v24, %v4336_v21  ;;  %v4363_v32 = vmul.f32 %v1994_v48, %v4273_v37  ;;  %v1146_v41 = vsel %vm1106_vm4, %v1143_v8, %v1145_v31  ;;  %v1204_v6 = vmul.f32 %v3835_v20, %v4330_v16  ;;  %v4812_v48 = vld [vmem:[#allocation33_spill] sm:$0xff]  ;;  %v4813_v31 = vld [vmem:[#allocation72_spill] sm:$0xff] }
 0x18a   : > { %v4360_v25 = vmul.f32 0.5, %v1868_v14  ;;  %v1870_v18 = vadd.f32 %v4084_v60, %v1850_v47  ;;  %v1900_v38 = vmul.f32 %v1868_v14, %v1868_v14  ;;  %v4368_v7 = vmul.f32 %v1995_v40, %v4275_v53 }
 0x18b   : > { %2332 = vst [vmem:[%s4349_s28] sm:$0xff] %v2331_v10   ;;  %v2336_v55 = vpack.c.bf16 %v4356_v52, %v4352_v17  ;;  %v1178_v23 = vadd.f32 %v1146_v41, %v4164_v13  ;;  %v1266_v42 = vrot.slane %v1203_v30, 2  ;;  %v1268_v8 = vrot.slane %v1204_v6, 2  ;;  %v4814_v10 = vld [vmem:[#allocation35_spill] sm:$0xff]  ;;  %v4815_v41 = vld [vmem:[#allocation68_spill] sm:$0xff] }
 0x18c   : > { %v4376_v37 = vmul.f32 0.5, %v1870_v18  ;;  %v1902_v54 = vmul.f32 %v1870_v18, %v1870_v18  ;;  %v1916_v15 = vmul.f32 %v1900_v38, %v1868_v14  ;;  %v2341_v53 = vpack.c.bf16 %v4368_v7, %v4363_v32 }
 0x18d   : > { %2368 = vst [vmem:[%s4349_s28 + $0x8] sm:$0xff] %v2336_v55   ;;  %v1333_v36 = vadd.f32 %v1317_v46, %v4806_v39  ;;  %v1357_v11 = vmul.f32 %v3806_v49, %v4155_v44  ;;  %v4808_v43 = vrot.slane %v4807_v22, 2  ;;  %v1358_v57 = vmul.f32 %v3806_v49, %v4330_v16 }
 0x18e   : > { %v1918_v12 = vmul.f32 %v1902_v54, %v1870_v18  ;;  %v1932_v13 = vmul.f32 0.044715, %v1916_v15  ;;  %2369 = vst [vmem:[%s4349_s28 + $0x10] sm:$0xff] %v2341_v53   ;;  %v1269_v30 = vsel %vm1229_vm10, %v1266_v42, %v1268_v8  ;;  %v1479_v46 = vmul.f32 %v3841_v29, %v4155_v44  ;;  %v4817_v54 = vld [vmem:[#allocation44_spill] sm:$0xff] }
 0x18f   : > { %v1267_v20 = vsel %vm1229_vm10, %v4808_v43, %v1266_v42  ;;  %v1417_v35 = vrot.slane %v1357_v11, 1  ;;  %v1301_v2 = vadd.f32 %v1269_v30, %v1178_v23  ;;  %v1419_v61 = vrot.slane %v1358_v57, 1  ;;  %v4819_v8 = vld [vmem:[#allocation36_spill] sm:$0xff]  ;;  %v4822_v30 = vld [vmem:[#allocation61_spill] sm:$0xff] }
 0x190   : > { %v1300_v19 = vadd.f32 %v1267_v20, %v1177_v56  ;;  %v1934_v4 = vmul.f32 0.044715, %v1918_v12  ;;  %v1948_v51 = vadd.f32 %v1932_v13, %v1868_v14  ;;  %v4811_v1 = vrot.slane %v4810_v33, 1  ;;  %v4820_v12 = vld [vmem:[#allocation45_spill] sm:$0xff]  ;;  %v4821_v20 = vld [vmem:[#allocation71_spill] sm:$0xff] }
 0x191   : > { %v1480_v49 = vmul.f32 %v3841_v29, %v4330_v16  ;;  %v1539_v34 = vrot.slane %v1479_v46, 2  ;;  %v1335_v58 = vadd.f32 %v4812_v48, %v1301_v2  ;;  %v1420_v47 = vsel %vm1106_vm4, %v1417_v35, %v1419_v61  ;;  %v4824_v46 = vld [vmem:[#allocation53_spill] sm:$0xff] }
 0x192   : > { %v1334_v45 = vadd.f32 %v4809_v59, %v1300_v19  ;;  %v1418_v3 = vsel %vm1106_vm4, %v4811_v1, %v1417_v35  ;;  %v1950_v27 = vadd.f32 %v1934_v4, %v1870_v18  ;;  %v1964_v56 = vmul.f32 0.7978846, %v1948_v51  ;;  %v4818_v18 = vld [vmem:[#allocation55_spill] sm:$0xff]  ;;  %v4825_v51 = vld [vmem:[#allocation12_spill] sm:$0xff]  ;;  %v4826_v59 = vld [vmem:[#allocation34_spill] sm:$0xff] }
 0x193   : > { %v1454_v14 = vadd.f32 %v1418_v3, %v4813_v31  ;;  %v1455_v40 = vadd.f32 %v1420_v47, %v1333_v36  ;;  %v4816_v55 = vrot.slane %v4815_v41, 2  ;;  %v1457_v29 = vadd.f32 %v4817_v54, %v1335_v58  ;;  %v4827_v33 = vld [vmem:[#allocation37_spill] sm:$0xff]  ;;  %v4830_v47 = vld [vmem:[#allocation62_spill] sm:$0xff] }
 0x194   : > { %v1456_v38 = vadd.f32 %v4814_v10, %v1334_v45  ;;  %v1966_v6 = vmul.f32 0.7978846, %v1950_v27  ;;  %2510 = vtanh.f32 %v1964_v56  ;;  %v1541_v15 = vrot.slane %v1480_v49, 2  ;;  %v4828_v27 = vld [vmem:[#allocation69_spill] sm:$0xff]  ;;  %v4831_v10 = vld [vmem:[#allocation46_spill] sm:$0xff] }
 0x195   : > { %v1540_v23 = vsel %vm1229_vm10, %v4816_v55, %v1539_v34  ;;  %v1574_v42 = vadd.f32 %v4818_v18, %v4289_v62  ;;  %v1593_v36 = vmul.f32 %v3896_v0, %v4155_v44  ;;  %v1579_v13 = vadd.f32 %v4820_v12, %v1457_v29  ;;  %v4823_v62 = vld [vmem:[#allocation14_spill] sm:$0xff] }
 0x196   : > { %v1576_v53 = vadd.f32 %v1540_v23, %v1454_v14  ;;  %v1578_v39 = vadd.f32 %v4819_v8, %v1456_v38  ;;  %2512 = vtanh.f32 %v1966_v6  ;;  %v1542_v11 = vsel %vm1229_vm10, %v1539_v34, %v1541_v15  ;;  %v4833_v6 = vld [vmem:[#allocation63_spill] sm:$0xff] }
 0x197   : > { %v1632_v22 = vmul.f32 %v3817_v50, %v4155_v44  ;;  %v1577_v43 = vadd.f32 %v1542_v11, %v1455_v40  ;;  %v1608_v57 = vadd.f32 %v4821_v20, %v1574_v42  ;;  %v1609_v19 = vadd.f32 %v1593_v36, %v4822_v30  ;;  %v4836_v36 = vld [vmem:[#allocation47_spill] sm:$0xff] }
 0x198   : > { %v1610_v35 = vadd.f32 %v4823_v62, %v1576_v53  ;;  %v1612_v4 = vadd.f32 %v4824_v46, %v1578_v39  ;;  %v1613_v2 = vadd.f32 %v4825_v51, %v1579_v13  ;;  %v1633_v0 = vmul.f32 %v3817_v50, %v4330_v16 }
 0x199   : > { %v1690_v61 = vrot.slane %v1632_v22, 1  ;;  %v1611_v45 = vadd.f32 %v4826_v59, %v1577_v43  ;;  %v1754_v3 = vmul.f32 %v3825_v5, %v4155_v44  ;;  %v1755_v49 = vmul.f32 %v3825_v5, %v4330_v16  ;;  %v4832_v5 = vld [vmem:[#allocation38_spill] sm:$0xff] }
 0x19a   : > { %v1732_v1 = vadd.f32 %v4827_v33, %v1610_v35  ;;  %v2511_v34 = vpop.eup %2510  ;;  %v4829_v56 = vrot.slane %v4828_v27, 1  ;;  %v1692_v58 = vrot.slane %v1633_v0, 1  ;;  %v1734_v31 = vadd.f32 %v4830_v47, %v1612_v4 }
 0x19b   : > { %v1735_v50 = vadd.f32 %v4146_v28, %v1613_v2  ;;  %v1996_v14 = vadd.f32 1.0, %v2511_v34  ;;  %v1733_v38 = vadd.f32 %v4831_v10, %v1611_v45  ;;  %v1812_v41 = vrot.slane %v1754_v3, 2  ;;  %v4834_v28 = vld [vmem:[#allocation70_spill] sm:$0xff] }
 0x19c   : > { %v1691_v48 = vsel %vm1106_vm4, %v4829_v56, %v1690_v61  ;;  %v2513_v55 = vpop.eup %2512  ;;  %v1693_v44 = vsel %vm1106_vm4, %v1690_v61, %v1692_v58  ;;  %v1814_v23 = vrot.slane %v1755_v49, 2  ;;  %v1854_v16 = vadd.f32 %v4832_v5, %v1732_v1 }
 0x19d   : > { %v1730_v40 = vadd.f32 %v1691_v48, %v1608_v57  ;;  %v1856_v54 = vadd.f32 %v4833_v6, %v1734_v31  ;;  %v1998_v29 = vadd.f32 1.0, %v2513_v55  ;;  %v4439_v15 = vmul.f32 %v1996_v14, %v4360_v25 }
 0x19e   : > { %v1731_v18 = vadd.f32 %v1693_v44, %v1609_v19  ;;  %v4835_v42 = vrot.slane %v4834_v28, 2  ;;  %v1815_v8 = vsel %vm1229_vm10, %v1812_v41, %v1814_v23  ;;  %v1855_v11 = vadd.f32 %v4836_v36, %v1733_v38 }
 0x19f   : > { %v1857_v12 = vadd.f32 %v4151_v9, %v1735_v50  ;;  %v4448_v13 = vmul.f32 %v1998_v29, %v4376_v37  ;;  %v2346_v25 = vpack.c.bf16 %v4198_v26, %v4439_v15  ;;  %v1874_v43 = vadd.f32 %v4084_v60, %v1854_v16 }
 0x1a0   : > { %v1813_v53 = vsel %vm1229_vm10, %v4835_v42, %v1812_v41  ;;  %v1853_v22 = vadd.f32 %v1815_v8, %v1731_v18  ;;  %v1875_v57 = vadd.f32 %v4084_v60, %v1855_v11  ;;  %v1876_v30 = vadd.f32 %v4084_v60, %v1856_v54 }
 0x1a1   : > { %v1852_v39 = vadd.f32 %v1813_v53, %v1730_v40  ;;  %v1877_v19 = vadd.f32 %v4084_v60, %v1857_v12  ;;  %2370 = vst [vmem:[%s4349_s28 + $0x18] sm:$0xff] %v2346_v25   ;;  %v2351_v9 = vpack.c.bf16 %v4228_v63, %v4448_v13  ;;  %v1906_v62 = vmul.f32 %v1874_v43, %v1874_v43 }
 0x1a2   : > { %v1873_v37 = vadd.f32 %v4084_v60, %v1853_v22  ;;  %v1907_v4 = vmul.f32 %v1875_v57, %v1875_v57  ;;  %v1908_v51 = vmul.f32 %v1876_v30, %v1876_v30  ;;  %v1890_v8 = vmul.f32 0.5, %v1874_v43 }
 0x1a3   : > { %v1872_v20 = vadd.f32 %v4084_v60, %v1852_v39  ;;  %2371 = vst [vmem:[%s4349_s28 + $0x20] sm:$0xff] %v2351_v9   ;;  %v1909_v2 = vmul.f32 %v1877_v19, %v1877_v19  ;;  %v1922_v0 = vmul.f32 %v1906_v62, %v1874_v43  ;;  %v1891_v39 = vmul.f32 0.5, %v1875_v57 }
 0x1a4   : > { %v1905_v46 = vmul.f32 %v1873_v37, %v1873_v37  ;;  %v1923_v45 = vmul.f32 %v1907_v4, %v1875_v57  ;;  %v1924_v33 = vmul.f32 %v1908_v51, %v1876_v30  ;;  %v1889_v28 = vmul.f32 0.5, %v1873_v37 }
 0x1a5   : > { %v1904_v35 = vmul.f32 %v1872_v20, %v1872_v20  ;;  %v1925_v1 = vmul.f32 %v1909_v2, %v1877_v19  ;;  %v1938_v3 = vmul.f32 0.044715, %v1922_v0  ;;  %v1888_v6 = vmul.f32 0.5, %v1872_v20 }
 0x1a6   : > { %v1921_v59 = vmul.f32 %v1905_v46, %v1873_v37  ;;  %v1939_v27 = vmul.f32 0.044715, %v1923_v45  ;;  %v1940_v56 = vmul.f32 0.044715, %v1924_v33  ;;  %v1892_v25 = vmul.f32 0.5, %v1876_v30 }
 0x1a7   : > { %v1920_v61 = vmul.f32 %v1904_v35, %v1872_v20  ;;  %v1941_v48 = vmul.f32 0.044715, %v1925_v1  ;;  %v1954_v60 = vadd.f32 %v1938_v3, %v1874_v43  ;;  %v1893_v62 = vmul.f32 0.5, %v1877_v19 }
 0x1a8   : > { %v1937_v34 = vmul.f32 0.044715, %v1921_v59  ;;  %v1955_v31 = vadd.f32 %v1939_v27, %v1875_v57  ;;  %v1956_v50 = vadd.f32 %v1940_v56, %v1876_v30 }
 0x1a9   : > { %v1936_v49 = vmul.f32 0.044715, %v1920_v61  ;;  %v1957_v14 = vadd.f32 %v1941_v48, %v1877_v19  ;;  %v1970_v40 = vmul.f32 0.7978846, %v1954_v60 }
 0x1aa   : > { %v1953_v47 = vadd.f32 %v1937_v34, %v1873_v37  ;;  %v1971_v41 = vmul.f32 0.7978846, %v1955_v31  ;;  %v1972_v55 = vmul.f32 0.7978846, %v1956_v50 }
 0x1ab   : > { %v1952_v58 = vadd.f32 %v1936_v49, %v1872_v20  ;;  %2514 = vtanh.f32 %v1970_v40  ;;  %v1973_v44 = vmul.f32 0.7978846, %v1957_v14 }
 0x1ac   : > { %v1969_v38 = vmul.f32 0.7978846, %v1953_v47 }
 0x1ad   : > { %v1968_v10 = vmul.f32 0.7978846, %v1952_v58 }
 0x1af   : > { %2516 = vtanh.f32 %v1968_v10 }
 0x1b0   : > { %2518 = vtanh.f32 %v1969_v38 }
 0x1b1   : > { %2520 = vtanh.f32 %v1971_v41  ;;  %v2515_v23 = vpop.eup %2514 }
 0x1b2   : > { %2522 = vtanh.f32 %v1972_v55  ;;  %v2002_v29 = vadd.f32 1.0, %v2515_v23 }
 0x1b3   : > { %2524 = vtanh.f32 %v1973_v44 }
 0x1b4   : > { %v2018_v20 = vmul.f32 %v2002_v29, %v1890_v8 }
 0x1b5   : > { %v2517_v5 = vpop.eup %2516 }
 0x1b6   : > { %v2519_v16 = vpop.eup %2518  ;;  %v2000_v54 = vadd.f32 1.0, %v2517_v5 }
 0x1b7   : > { %v2521_v18 = vpop.eup %2520  ;;  %v2001_v42 = vadd.f32 1.0, %v2519_v16 }
 0x1b8   : > { %v2523_v53 = vpop.eup %2522  ;;  %v2003_v36 = vadd.f32 1.0, %v2521_v18  ;;  %v2016_v11 = vmul.f32 %v2000_v54, %v1888_v6 }
 0x1b9   : > { %v2525_v12 = vpop.eup %2524  ;;  %v2004_v22 = vadd.f32 1.0, %v2523_v53  ;;  %v2017_v9 = vmul.f32 %v2001_v42, %v1889_v28 }
 0x1ba   : > { %v2005_v35 = vadd.f32 1.0, %v2525_v12  ;;  %v2019_v46 = vmul.f32 %v2003_v36, %v1891_v39 }
 0x1bb   : > { %v2356_v4 = vpack.c.bf16 %v2017_v9, %v2016_v11  ;;  %v2020_v51 = vmul.f32 %v2004_v22, %v1892_v25 }
 0x1bc   : > { %v2021_v37 = vmul.f32 %v2005_v35, %v1893_v62  ;;  %v2361_v2 = vpack.c.bf16 %v2019_v46, %v2018_v20  ;;  %2057 = sbr.rel (%p2307_p7) target bundleno = 451 (0x1c3), region = 44 }
 0x1bd   : > { %2372 = vst [vmem:[%s4349_s28 + $0x28] sm:$0xff] %v2356_v4  }
 0x1be   : > { %2373 = vst [vmem:[%s4349_s28 + $0x30] sm:$0xff] %v2361_v2   ;;  %v2366_v43 = vpack.c.bf16 %v2021_v37, %v2020_v51 }
 0x1c0   : > { %2374 = vst [vmem:[%s4349_s28 + $0x38] sm:$0xff] %v2366_v43  }
 0x1c1   : > { %v2576_v57 = vmov 0.0  }
 0x1c2   : > { %2058 = vst [vmem:[%s2658_s13] sm:$0xff] %v2576_v57 }
 0x1c3 PF: > { %v2060_v30 = vadd.f32 %v4342_v24, %v4336_v21 }
 0x1c5   : > { %v2061_v19 = vadd.f32 %v2060_v30, %v4352_v17 }
 0x1c7   : > { %v2062_v0 = vadd.f32 %v2061_v19, %v4356_v52 }
 0x1c9   : > { %v2063_v61 = vadd.f32 %v2062_v0, %v4363_v32  ;;  %v2059_v60 = vld [vmem:[%s2658_s13] sm:$0xff] }
 0x1cb   : > { %v2064_v59 = vadd.f32 %v2063_v61, %v4368_v7 }
 0x1cd   : > { %v2065_v45 = vadd.f32 %v2064_v59, %v4439_v15 }
 0x1cf   : > { %v2066_v33 = vadd.f32 %v2065_v45, %v4198_v26 }
 0x1d1   : > { %v2067_v1 = vadd.f32 %v2066_v33, %v4448_v13 }
 0x1d3   : > { %v2068_v3 = vadd.f32 %v2067_v1, %v4228_v63 }
 0x1d5   : > { %v2069_v49 = vadd.f32 %v2068_v3, %v2016_v11 }
 0x1d7   : > { %v2070_v21 = vadd.f32 %v2069_v49, %v2017_v9 }
 0x1d9   : > { %v2071_v24 = vadd.f32 %v2070_v21, %v2018_v20 }
 0x1db   : > { %v2072_v17 = vadd.f32 %v2071_v24, %v2019_v46 }
 0x1dd   : > { %v2073_v34 = vadd.f32 %v2072_v17, %v2020_v51 }
 0x1df   : > { %v2074_v52 = vadd.f32 %v2073_v34, %v2021_v37 }
 0x1e1   : > { %v2075_v27 = vrot.slane %v2074_v52, 4 }
 0x1e3   : > { %v2076_v32 = vadd.f32 %v2075_v27, %v2074_v52 }
 0x1e5   : > { %v2077_v56 = vrot.slane %v2076_v32, 2 }
 0x1e7   : > { %v2078_v7 = vadd.f32 %v2077_v56, %v2076_v32 }
 0x1e9   : > { %v2079_v48 = vrot.slane %v2078_v7, 1 }
 0x1eb   : > { %v2080_v15 = vadd.f32 %v2079_v48, %v2078_v7 }
 0x1ed   : > { %v2081_v58 = vadd.f32 %v2080_v15, %v2059_v60 }
 0x1ef   : > { %2082 = vst [vmem:[%s2658_s13] sm:$0xff] %v2081_v58 }
 0x1f0 PF: > { %s17_s25 = sadd.s32 1, %s2574_s25   ;;  %s4837_s21 = smov %s2566_s23 }
 0x1f1   : > { %p14_p8 = scmp.ge.s32.totalorder %s17_s25, 6   ;;  %s4838_s22 = smov %s2570_s24 }
 0x1f2   : > { %s4839_s23 = smov %s4842_s26  ;;  %s4840_s24 = smov %s4846_s27 }
 0x1f3   :  { %16 = sbr.rel (!%p14_p8) target bundleno = 3 (0x3), region = 87 }

</bundles_post_ra>
